<compile_context>
chip_gen: v7x
topology: tpu7x:2x2x1
jax: 0.10.0
libtpu: 0.0.40
codegen_flags: <defaults>
</compile_context>

<pallas_src>
import numpy as np
import jax
import jax.numpy as jnp
from jax import lax
from jax.experimental import pallas as pl
from jax.experimental.pallas import tpu as pltpu

LOG_SIG_MAX = 2
LOG_SIG_MIN = -20


def _round_up(x, m):
    return ((x + m - 1) // m) * m


def _mish_kernel(x):
    # x * tanh(softplus(x)) with a single transcendental:
    #   tanh(log(1+e)) = e*(e+2) / (e*(e+2) + 2),  e = exp(x)
    # clamp before exp: for x >= 20 the ratio is 1.0 in f32 anyway.
    e = jnp.exp(jnp.minimum(x, 20.0))
    p = e * (e + 2.0)
    return x * p * pl.reciprocal(p + 2.0, approx=True)


def _make_kernel(n_layers, action_dim):
    def kernel(x_ref, eps_ref, sig_ref, rest_ref, *refs):
        out_ref = refs[-1]
        wb = refs[:-1]                       # w0,b0, ..., w6,b6, wl, bl

        h = x_ref[...]                       # (TR, 128) f32, zero-padded cols
        for l in range(n_layers):            # statically unrolled
            w = wb[2 * l][...]               # bf16 (din_pad, dout_pad)
            b = wb[2 * l + 1][...]           # f32  (1, dout_pad)
            h = jnp.dot(h.astype(jnp.bfloat16), w,
                        preferred_element_type=jnp.float32) + b
            h = _mish_kernel(h)              # Mish(0)=0 -> zero pad propagates

        wl = wb[2 * n_layers][...]           # bf16 (128, 128)
        bl = wb[2 * n_layers + 1][...]       # f32  (1, 128)
        mean = jnp.dot(h.astype(jnp.bfloat16), wl,
                       preferred_element_type=jnp.float32) + bl   # (TR, 128)

        eps = eps_ref[...]                   # (TR, 128) f32, zero-padded lanes
        action = eps * sig_ref[...] + mean   # reparameterized sample

        # log_prob of the sample: (mean-action)^2/cov == eps^2 exactly.
        lp = -0.5 * jnp.sum(eps * eps, axis=-1, keepdims=True) - rest_ref[0]

        # pack lp into lane `action_dim` of the (zero there) mean slab.
        lane = lax.broadcasted_iota(jnp.int32, mean.shape, 1)
        mean_lp = jnp.where(lane == action_dim, lp, mean)

        apad = mean.shape[-1]                # 128 (static)
        out_ref[:, :apad] = action           # unmasked 128-lane stores
        out_ref[:, apad:] = mean_lp
    return kernel


def _init_linear(key, fan_in, fan_out):
    """PyTorch nn.Linear default init, stored as (in, out)."""
    kw, kb = jax.random.split(key)
    bound = 1.0 / np.sqrt(fan_in)
    w = jax.random.uniform(kw, (fan_in, fan_out), jnp.float32, -bound, bound)
    b = jax.random.uniform(kb, (fan_out,), jnp.float32, -bound, bound)
    return w, b


def make_bcmlpnet_params(key, observation_dim, action_dim, dim=32,
                         dim_mults=(1, 2, 4, 8)):
    dims = [observation_dim] + [dim * m for m in dim_mults]
    in_out = list(zip(dims[:-1], dims[1:]))
    # forward stack then mirrored stack, exactly as the PyTorch module builds it
    layer_dims = list(in_out) + [(do, di) for (di, do) in reversed(in_out[1:])]

    keys = jax.random.split(key, len(layer_dims) + 1)
    weights, biases = [], []
    for k, (di, do) in zip(keys[:-1], layer_dims):
        w, b = _init_linear(k, di, do)
        weights.append(np.asarray(w))
        biases.append(np.asarray(b))

    # last_fc: weight *= 0.1, bias *= 0.0
    wl, _ = _init_linear(keys[-1], dim, action_dim)
    wl = np.asarray(wl) * 0.1
    bl = np.zeros((action_dim,), np.float32)

    # conditioned_std=False -> action_log_std = zeros(1, action_dim)
    action_log_std = jnp.zeros((1, action_dim), jnp.float32)

    # per-layer padding to next multiple of 128; weights in bf16, biases f32
    w_pad, b_pad = [], []
    for (di, do), w, b in zip(layer_dims, weights, biases):
        dip, dop = _round_up(di, 128), _round_up(do, 128)
        wp = np.zeros((dip, dop), np.float32)
        wp[:di, :do] = w
        bp = np.zeros((1, dop), np.float32)
        bp[0, :do] = b
        w_pad.append(jnp.asarray(wp, jnp.bfloat16))
        b_pad.append(jnp.asarray(bp, jnp.float32))

    apad = _round_up(action_dim, 128)
    dimp = _round_up(dim, 128)
    wlp = np.zeros((dimp, apad), np.float32)
    wlp[:dim, :action_dim] = wl
    blp = np.zeros((1, apad), np.float32)
    blp[0, :action_dim] = bl

    return dict(
        w_pad=w_pad, b_pad=b_pad,
        wl=jnp.asarray(wlp, jnp.bfloat16), bl=jnp.asarray(blp),
        action_log_std=action_log_std,
        # unpadded f32 originals for the pure-JAX reference
        weights_f32=[jnp.asarray(w) for w in weights],
        biases_f32=[jnp.asarray(b) for b in biases],
        wl_f32=jnp.asarray(wl), bl_f32=jnp.asarray(bl),
        layer_dims=layer_dims,
        observation_dim=observation_dim, action_dim=action_dim,
        obs_pad=_round_up(observation_dim, 128), act_pad=apad,
    )


def bcmlpnet_forward(params, obs, eps, row_tile=256):
    """obs: [batch, agent, obs_dim]; eps: [batch, agent, action_dim] ~ N(0,1)."""
    B, G, Do = obs.shape
    A = params["action_dim"]
    apad = params["act_pad"]
    obs_pad = params["obs_pad"]
    n_layers = len(params["layer_dims"])

    R = B * G
    TR = min(row_tile, _round_up(R, 8))           # row tile (multiple of 8)
    R_pad = _round_up(R, TR)
    n_tiles = R_pad // TR

    x = obs.reshape(R, Do).astype(jnp.float32)
    x = jnp.pad(x, ((0, R_pad - R), (0, obs_pad - Do)))
    eps_flat = jnp.pad(eps.reshape(R, A).astype(jnp.float32),
                       ((0, R_pad - R), (0, apad - A)))

    # constants hoisted out of the kernel (row-independent)
    log_std = params["action_log_std"]                            # (1, A)
    sig_pad = jnp.pad(jnp.exp(log_std), ((0, 0), (0, apad - A)))  # (1, apad)
    rest = (jnp.sum(log_std, axis=-1)
            + 0.5 * np.log(2.0 * np.pi)).astype(jnp.float32)      # (1,)

    def const_spec(arr):
        # full-array block, constant index -> resident in VMEM across the grid
        return pl.BlockSpec(arr.shape, lambda i: (0, 0))

    wb_inputs, wb_specs = [], []
    for l in range(n_layers):
        w = params["w_pad"][l]
        b = params["b_pad"][l]
        wb_inputs += [w, b]
        wb_specs += [const_spec(w), const_spec(b)]
    wb_inputs += [params["wl"], params["bl"]]
    wb_specs += [const_spec(params["wl"]), const_spec(params["bl"])]

    in_specs = ([pl.BlockSpec((TR, obs_pad), lambda i: (i, 0)),
                 pl.BlockSpec((TR, apad), lambda i: (i, 0)),
                 const_spec(sig_pad),
                 pl.BlockSpec(memory_space=pltpu.MemorySpace.SMEM)]
                + wb_specs)

    out_spec = pl.BlockSpec((TR, 2 * apad), lambda i: (i, 0))
    out_shape = jax.ShapeDtypeStruct((R_pad, 2 * apad), jnp.float32)

    packed = pl.pallas_call(
        _make_kernel(n_layers, A),
        out_shape=out_shape,
        grid=(n_tiles,),
        in_specs=in_specs,
        out_specs=out_spec,
        compiler_params=pltpu.CompilerParams(
            dimension_semantics=("parallel",),
            vmem_limit_bytes=32 * 1024 * 1024),
    )(x, eps_flat, sig_pad, rest, *wb_inputs)

    action = packed[:R, :A]
    mean = packed[:R, apad:apad + A]
    log_prob = packed[:R, apad + A:apad + A + 1]
    log_std_out = jnp.broadcast_to(log_std, (R, A))

    return (action.reshape(B, G, A), mean.reshape(B, G, A),
            log_std_out.reshape(B, G, A), log_prob.reshape(B, G, 1))


def bcmlpnet_forward_ref(params, obs, eps):
    """Pure-JAX f32 reference (PyTorch semantics) for the correctness check."""
    B, G, Do = obs.shape
    A = params["action_dim"]
    h = obs.reshape(B * G, Do).astype(jnp.float32)
    for w, b in zip(params["weights_f32"], params["biases_f32"]):
        h = jnp.dot(h, w, precision=lax.Precision.HIGHEST) + b
        h = h * jnp.tanh(jax.nn.softplus(h))              # nn.Mish
    mean = jnp.dot(h, params["wl_f32"],
                   precision=lax.Precision.HIGHEST) + params["bl_f32"]
    log_std = jnp.broadcast_to(params["action_log_std"], mean.shape)
    sig = jnp.exp(log_std)
    action = eps.reshape(B * G, A) * sig + mean
    cov = jnp.exp(2.0 * log_std)
    lp = -0.5 * jnp.sum((mean - action) ** 2 / cov, axis=-1, keepdims=True)
    lp = lp - (jnp.sum(log_std, axis=-1, keepdims=True) + 0.5 * np.log(2.0 * np.pi))
    return (action.reshape(B, G, A), mean.reshape(B, G, A),
            log_std.reshape(B, G, A), lp.reshape(B, G, 1))


if __name__ == "__main__":
    batch, agent = 2, 4
    observation_dim, action_dim = 16, 8
    dim, dim_mults = 32, (1, 2, 4, 8)

    root = jax.random.PRNGKey(0)
    k_param, k_obs, k_eps = jax.random.split(root, 3)

    params = make_bcmlpnet_params(k_param, observation_dim, action_dim,
                                  dim=dim, dim_mults=dim_mults)
    obs = jax.random.normal(k_obs, (batch, agent, observation_dim), jnp.float32)
    # torch.randn inside ReparamMultivariateNormalDiag.sample() -> explicit eps
    eps = jax.random.normal(k_eps, (batch, agent, action_dim), jnp.float32)

    action, mean, log_std, log_prob = jax.block_until_ready(
        bcmlpnet_forward(params, obs, eps))

    a_ref, m_ref, ls_ref, lp_ref = bcmlpnet_forward_ref(params, obs, eps)
    np.testing.assert_allclose(np.asarray(action), np.asarray(a_ref), rtol=5e-2, atol=5e-2)
    np.testing.assert_allclose(np.asarray(mean), np.asarray(m_ref), rtol=5e-2, atol=5e-2)
    np.testing.assert_allclose(np.asarray(log_std), np.asarray(ls_ref), rtol=5e-2, atol=5e-2)
    np.testing.assert_allclose(np.asarray(log_prob), np.asarray(lp_ref), rtol=5e-2, atol=5e-2)

    print("KERNEL_OK")
</pallas_src>

<mosaic_0001>
module attributes {stable_mosaic.version = 11 : i64} {
  func.func @kernel(%arg0: i32, %arg1: memref<8x128xf32, #tpu.memory_space<vmem>>, %arg2: memref<8x128xf32, #tpu.memory_space<vmem>>, %arg3: memref<1x128xf32, #tpu.memory_space<vmem>>, %arg4: memref<1xf32, #tpu.memory_space<smem>>, %arg5: memref<128x128xbf16, #tpu.memory_space<vmem>>, %arg6: memref<1x128xf32, #tpu.memory_space<vmem>>, %arg7: memref<128x128xbf16, #tpu.memory_space<vmem>>, %arg8: memref<1x128xf32, #tpu.memory_space<vmem>>, %arg9: memref<128x128xbf16, #tpu.memory_space<vmem>>, %arg10: memref<1x128xf32, #tpu.memory_space<vmem>>, %arg11: memref<128x256xbf16, #tpu.memory_space<vmem>>, %arg12: memref<1x256xf32, #tpu.memory_space<vmem>>, %arg13: memref<256x128xbf16, #tpu.memory_space<vmem>>, %arg14: memref<1x128xf32, #tpu.memory_space<vmem>>, %arg15: memref<128x128xbf16, #tpu.memory_space<vmem>>, %arg16: memref<1x128xf32, #tpu.memory_space<vmem>>, %arg17: memref<128x128xbf16, #tpu.memory_space<vmem>>, %arg18: memref<1x128xf32, #tpu.memory_space<vmem>>, %arg19: memref<128x128xbf16, #tpu.memory_space<vmem>>, %arg20: memref<1x128xf32, #tpu.memory_space<vmem>>, %arg21: memref<8x256xf32, #tpu.memory_space<vmem>>) attributes {dimension_semantics = [#tpu.dimension_semantics<parallel>], iteration_bounds = array<i64: 1>, scalar_prefetch = 0 : i64, scratch_operands = 0 : i64, tpu.core_type = #tpu.core_type<tc>, window_params = [{transform_indices = @transform_0, window_bounds = array<i64: 8, 128>}, {transform_indices = @transform_1, window_bounds = array<i64: 8, 128>}, {pipeline_mode = #tpu.pipeline_mode<synchronous>, transform_indices = @transform_2, window_bounds = array<i64: 1, 128>}, {transform_indices = @transform_3, window_bounds = array<i64: 1>}, {pipeline_mode = #tpu.pipeline_mode<synchronous>, transform_indices = @transform_4, window_bounds = array<i64: 128, 128>}, {pipeline_mode = #tpu.pipeline_mode<synchronous>, transform_indices = @transform_5, window_bounds = array<i64: 1, 128>}, {pipeline_mode = #tpu.pipeline_mode<synchronous>, transform_indices = @transform_6, window_bounds = array<i64: 128, 128>}, {pipeline_mode = #tpu.pipeline_mode<synchronous>, transform_indices = @transform_7, window_bounds = array<i64: 1, 128>}, {pipeline_mode = #tpu.pipeline_mode<synchronous>, transform_indices = @transform_8, window_bounds = array<i64: 128, 128>}, {pipeline_mode = #tpu.pipeline_mode<synchronous>, transform_indices = @transform_9, window_bounds = array<i64: 1, 128>}, {pipeline_mode = #tpu.pipeline_mode<synchronous>, transform_indices = @transform_10, window_bounds = array<i64: 128, 256>}, {pipeline_mode = #tpu.pipeline_mode<synchronous>, transform_indices = @transform_11, window_bounds = array<i64: 1, 256>}, {pipeline_mode = #tpu.pipeline_mode<synchronous>, transform_indices = @transform_12, window_bounds = array<i64: 256, 128>}, {pipeline_mode = #tpu.pipeline_mode<synchronous>, transform_indices = @transform_13, window_bounds = array<i64: 1, 128>}, {pipeline_mode = #tpu.pipeline_mode<synchronous>, transform_indices = @transform_14, window_bounds = array<i64: 128, 128>}, {pipeline_mode = #tpu.pipeline_mode<synchronous>, transform_indices = @transform_15, window_bounds = array<i64: 1, 128>}, {pipeline_mode = #tpu.pipeline_mode<synchronous>, transform_indices = @transform_16, window_bounds = array<i64: 128, 128>}, {pipeline_mode = #tpu.pipeline_mode<synchronous>, transform_indices = @transform_17, window_bounds = array<i64: 1, 128>}, {pipeline_mode = #tpu.pipeline_mode<synchronous>, transform_indices = @transform_18, window_bounds = array<i64: 128, 128>}, {pipeline_mode = #tpu.pipeline_mode<synchronous>, transform_indices = @transform_19, window_bounds = array<i64: 1, 128>}, {transform_indices = @transform_20, window_bounds = array<i64: 8, 256>}]} {
    %c0 = arith.constant 0 : index
    %c0_0 = arith.constant 0 : index
    %0 = vector.load %arg1[%c0, %c0_0] : memref<8x128xf32, #tpu.memory_space<vmem>>, vector<8x128xf32>
    %c0_1 = arith.constant 0 : index
    %c0_2 = arith.constant 0 : index
    %1 = vector.load %arg5[%c0_1, %c0_2] : memref<128x128xbf16, #tpu.memory_space<vmem>>, vector<128x128xbf16>
    %c0_3 = arith.constant 0 : index
    %c0_4 = arith.constant 0 : index
    %2 = vector.load %arg6[%c0_3, %c0_4] : memref<1x128xf32, #tpu.memory_space<vmem>>, vector<1x128xf32>
    %3 = arith.truncf %0 : vector<8x128xf32> to vector<8x128xbf16>
    %cst = arith.constant dense<0.000000e+00> : vector<8x128xf32>
    %4 = tpu.matmul %3, %1, %cst {dimension_numbers = #tpu.dot_dimension_numbers<[1], [0], [0], [1], [0, 0, 1, 1], [], []>} : vector<8x128xbf16>, vector<128x128xbf16>, vector<8x128xf32> -> vector<8x128xf32>
    %5 = vector.broadcast %2 : vector<1x128xf32> to vector<8x128xf32>
    %6 = arith.addf %4, %5 : vector<8x128xf32>
    %cst_5 = arith.constant 2.000000e+01 : f32
    %7 = vector.broadcast %cst_5 : f32 to vector<8x128xf32>
    %8 = arith.minimumf %6, %7 : vector<8x128xf32>
    %9 = math.exp %8 : vector<8x128xf32>
    %cst_6 = arith.constant 2.000000e+00 : f32
    %10 = vector.broadcast %cst_6 : f32 to vector<8x128xf32>
    %11 = arith.addf %9, %10 : vector<8x128xf32>
    %12 = arith.mulf %9, %11 : vector<8x128xf32>
    %13 = arith.mulf %6, %12 : vector<8x128xf32>
    %cst_7 = arith.constant 2.000000e+00 : f32
    %14 = vector.broadcast %cst_7 : f32 to vector<8x128xf32>
    %15 = arith.addf %12, %14 : vector<8x128xf32>
    %16 = tpu.reciprocal %15 {approx = true} : vector<8x128xf32> -> vector<8x128xf32>
    %17 = arith.mulf %13, %16 : vector<8x128xf32>
    %c0_8 = arith.constant 0 : index
    %c0_9 = arith.constant 0 : index
    %18 = vector.load %arg7[%c0_8, %c0_9] : memref<128x128xbf16, #tpu.memory_space<vmem>>, vector<128x128xbf16>
    %c0_10 = arith.constant 0 : index
    %c0_11 = arith.constant 0 : index
    %19 = vector.load %arg8[%c0_10, %c0_11] : memref<1x128xf32, #tpu.memory_space<vmem>>, vector<1x128xf32>
    %20 = arith.truncf %17 : vector<8x128xf32> to vector<8x128xbf16>
    %cst_12 = arith.constant dense<0.000000e+00> : vector<8x128xf32>
    %21 = tpu.matmul %20, %18, %cst_12 {dimension_numbers = #tpu.dot_dimension_numbers<[1], [0], [0], [1], [0, 0, 1, 1], [], []>} : vector<8x128xbf16>, vector<128x128xbf16>, vector<8x128xf32> -> vector<8x128xf32>
    %22 = vector.broadcast %19 : vector<1x128xf32> to vector<8x128xf32>
    %23 = arith.addf %21, %22 : vector<8x128xf32>
    %cst_13 = arith.constant 2.000000e+01 : f32
    %24 = vector.broadcast %cst_13 : f32 to vector<8x128xf32>
    %25 = arith.minimumf %23, %24 : vector<8x128xf32>
    %26 = math.exp %25 : vector<8x128xf32>
    %cst_14 = arith.constant 2.000000e+00 : f32
    %27 = vector.broadcast %cst_14 : f32 to vector<8x128xf32>
    %28 = arith.addf %26, %27 : vector<8x128xf32>
    %29 = arith.mulf %26, %28 : vector<8x128xf32>
    %30 = arith.mulf %23, %29 : vector<8x128xf32>
    %cst_15 = arith.constant 2.000000e+00 : f32
    %31 = vector.broadcast %cst_15 : f32 to vector<8x128xf32>
    %32 = arith.addf %29, %31 : vector<8x128xf32>
    %33 = tpu.reciprocal %32 {approx = true} : vector<8x128xf32> -> vector<8x128xf32>
    %34 = arith.mulf %30, %33 : vector<8x128xf32>
    %c0_16 = arith.constant 0 : index
    %c0_17 = arith.constant 0 : index
    %35 = vector.load %arg9[%c0_16, %c0_17] : memref<128x128xbf16, #tpu.memory_space<vmem>>, vector<128x128xbf16>
    %c0_18 = arith.constant 0 : index
    %c0_19 = arith.constant 0 : index
    %36 = vector.load %arg10[%c0_18, %c0_19] : memref<1x128xf32, #tpu.memory_space<vmem>>, vector<1x128xf32>
    %37 = arith.truncf %34 : vector<8x128xf32> to vector<8x128xbf16>
    %cst_20 = arith.constant dense<0.000000e+00> : vector<8x128xf32>
    %38 = tpu.matmul %37, %35, %cst_20 {dimension_numbers = #tpu.dot_dimension_numbers<[1], [0], [0], [1], [0, 0, 1, 1], [], []>} : vector<8x128xbf16>, vector<128x128xbf16>, vector<8x128xf32> -> vector<8x128xf32>
    %39 = vector.broadcast %36 : vector<1x128xf32> to vector<8x128xf32>
    %40 = arith.addf %38, %39 : vector<8x128xf32>
    %cst_21 = arith.constant 2.000000e+01 : f32
    %41 = vector.broadcast %cst_21 : f32 to vector<8x128xf32>
    %42 = arith.minimumf %40, %41 : vector<8x128xf32>
    %43 = math.exp %42 : vector<8x128xf32>
    %cst_22 = arith.constant 2.000000e+00 : f32
    %44 = vector.broadcast %cst_22 : f32 to vector<8x128xf32>
    %45 = arith.addf %43, %44 : vector<8x128xf32>
    %46 = arith.mulf %43, %45 : vector<8x128xf32>
    %47 = arith.mulf %40, %46 : vector<8x128xf32>
    %cst_23 = arith.constant 2.000000e+00 : f32
    %48 = vector.broadcast %cst_23 : f32 to vector<8x128xf32>
    %49 = arith.addf %46, %48 : vector<8x128xf32>
    %50 = tpu.reciprocal %49 {approx = true} : vector<8x128xf32> -> vector<8x128xf32>
    %51 = arith.mulf %47, %50 : vector<8x128xf32>
    %c0_24 = arith.constant 0 : index
    %c0_25 = arith.constant 0 : index
    %52 = vector.load %arg11[%c0_24, %c0_25] : memref<128x256xbf16, #tpu.memory_space<vmem>>, vector<128x256xbf16>
    %c0_26 = arith.constant 0 : index
    %c0_27 = arith.constant 0 : index
    %53 = vector.load %arg12[%c0_26, %c0_27] : memref<1x256xf32, #tpu.memory_space<vmem>>, vector<1x256xf32>
    %54 = arith.truncf %51 : vector<8x128xf32> to vector<8x128xbf16>
    %cst_28 = arith.constant dense<0.000000e+00> : vector<8x256xf32>
    %55 = tpu.matmul %54, %52, %cst_28 {dimension_numbers = #tpu.dot_dimension_numbers<[1], [0], [0], [1], [0, 0, 1, 1], [], []>} : vector<8x128xbf16>, vector<128x256xbf16>, vector<8x256xf32> -> vector<8x256xf32>
    %56 = vector.broadcast %53 : vector<1x256xf32> to vector<8x256xf32>
    %57 = arith.addf %55, %56 : vector<8x256xf32>
    %cst_29 = arith.constant 2.000000e+01 : f32
    %58 = vector.broadcast %cst_29 : f32 to vector<8x256xf32>
    %59 = arith.minimumf %57, %58 : vector<8x256xf32>
    %60 = math.exp %59 : vector<8x256xf32>
    %cst_30 = arith.constant 2.000000e+00 : f32
    %61 = vector.broadcast %cst_30 : f32 to vector<8x256xf32>
    %62 = arith.addf %60, %61 : vector<8x256xf32>
    %63 = arith.mulf %60, %62 : vector<8x256xf32>
    %64 = arith.mulf %57, %63 : vector<8x256xf32>
    %cst_31 = arith.constant 2.000000e+00 : f32
    %65 = vector.broadcast %cst_31 : f32 to vector<8x256xf32>
    %66 = arith.addf %63, %65 : vector<8x256xf32>
    %67 = tpu.reciprocal %66 {approx = true} : vector<8x256xf32> -> vector<8x256xf32>
    %68 = arith.mulf %64, %67 : vector<8x256xf32>
    %c0_32 = arith.constant 0 : index
    %c0_33 = arith.constant 0 : index
    %69 = vector.load %arg13[%c0_32, %c0_33] : memref<256x128xbf16, #tpu.memory_space<vmem>>, vector<256x128xbf16>
    %c0_34 = arith.constant 0 : index
    %c0_35 = arith.constant 0 : index
    %70 = vector.load %arg14[%c0_34, %c0_35] : memref<1x128xf32, #tpu.memory_space<vmem>>, vector<1x128xf32>
    %71 = arith.truncf %68 : vector<8x256xf32> to vector<8x256xbf16>
    %cst_36 = arith.constant dense<0.000000e+00> : vector<8x128xf32>
    %72 = tpu.matmul %71, %69, %cst_36 {dimension_numbers = #tpu.dot_dimension_numbers<[1], [0], [0], [1], [0, 0, 1, 1], [], []>} : vector<8x256xbf16>, vector<256x128xbf16>, vector<8x128xf32> -> vector<8x128xf32>
    %73 = vector.broadcast %70 : vector<1x128xf32> to vector<8x128xf32>
    %74 = arith.addf %72, %73 : vector<8x128xf32>
    %cst_37 = arith.constant 2.000000e+01 : f32
    %75 = vector.broadcast %cst_37 : f32 to vector<8x128xf32>
    %76 = arith.minimumf %74, %75 : vector<8x128xf32>
    %77 = math.exp %76 : vector<8x128xf32>
    %cst_38 = arith.constant 2.000000e+00 : f32
    %78 = vector.broadcast %cst_38 : f32 to vector<8x128xf32>
    %79 = arith.addf %77, %78 : vector<8x128xf32>
    %80 = arith.mulf %77, %79 : vector<8x128xf32>
    %81 = arith.mulf %74, %80 : vector<8x128xf32>
    %cst_39 = arith.constant 2.000000e+00 : f32
    %82 = vector.broadcast %cst_39 : f32 to vector<8x128xf32>
    %83 = arith.addf %80, %82 : vector<8x128xf32>
    %84 = tpu.reciprocal %83 {approx = true} : vector<8x128xf32> -> vector<8x128xf32>
    %85 = arith.mulf %81, %84 : vector<8x128xf32>
    %c0_40 = arith.constant 0 : index
    %c0_41 = arith.constant 0 : index
    %86 = vector.load %arg15[%c0_40, %c0_41] : memref<128x128xbf16, #tpu.memory_space<vmem>>, vector<128x128xbf16>
    %c0_42 = arith.constant 0 : index
    %c0_43 = arith.constant 0 : index
    %87 = vector.load %arg16[%c0_42, %c0_43] : memref<1x128xf32, #tpu.memory_space<vmem>>, vector<1x128xf32>
    %88 = arith.truncf %85 : vector<8x128xf32> to vector<8x128xbf16>
    %cst_44 = arith.constant dense<0.000000e+00> : vector<8x128xf32>
    %89 = tpu.matmul %88, %86, %cst_44 {dimension_numbers = #tpu.dot_dimension_numbers<[1], [0], [0], [1], [0, 0, 1, 1], [], []>} : vector<8x128xbf16>, vector<128x128xbf16>, vector<8x128xf32> -> vector<8x128xf32>
    %90 = vector.broadcast %87 : vector<1x128xf32> to vector<8x128xf32>
    %91 = arith.addf %89, %90 : vector<8x128xf32>
    %cst_45 = arith.constant 2.000000e+01 : f32
    %92 = vector.broadcast %cst_45 : f32 to vector<8x128xf32>
    %93 = arith.minimumf %91, %92 : vector<8x128xf32>
    %94 = math.exp %93 : vector<8x128xf32>
    %cst_46 = arith.constant 2.000000e+00 : f32
    %95 = vector.broadcast %cst_46 : f32 to vector<8x128xf32>
    %96 = arith.addf %94, %95 : vector<8x128xf32>
    %97 = arith.mulf %94, %96 : vector<8x128xf32>
    %98 = arith.mulf %91, %97 : vector<8x128xf32>
    %cst_47 = arith.constant 2.000000e+00 : f32
    %99 = vector.broadcast %cst_47 : f32 to vector<8x128xf32>
    %100 = arith.addf %97, %99 : vector<8x128xf32>
    %101 = tpu.reciprocal %100 {approx = true} : vector<8x128xf32> -> vector<8x128xf32>
    %102 = arith.mulf %98, %101 : vector<8x128xf32>
    %c0_48 = arith.constant 0 : index
    %c0_49 = arith.constant 0 : index
    %103 = vector.load %arg17[%c0_48, %c0_49] : memref<128x128xbf16, #tpu.memory_space<vmem>>, vector<128x128xbf16>
    %c0_50 = arith.constant 0 : index
    %c0_51 = arith.constant 0 : index
    %104 = vector.load %arg18[%c0_50, %c0_51] : memref<1x128xf32, #tpu.memory_space<vmem>>, vector<1x128xf32>
    %105 = arith.truncf %102 : vector<8x128xf32> to vector<8x128xbf16>
    %cst_52 = arith.constant dense<0.000000e+00> : vector<8x128xf32>
    %106 = tpu.matmul %105, %103, %cst_52 {dimension_numbers = #tpu.dot_dimension_numbers<[1], [0], [0], [1], [0, 0, 1, 1], [], []>} : vector<8x128xbf16>, vector<128x128xbf16>, vector<8x128xf32> -> vector<8x128xf32>
    %107 = vector.broadcast %104 : vector<1x128xf32> to vector<8x128xf32>
    %108 = arith.addf %106, %107 : vector<8x128xf32>
    %cst_53 = arith.constant 2.000000e+01 : f32
    %109 = vector.broadcast %cst_53 : f32 to vector<8x128xf32>
    %110 = arith.minimumf %108, %109 : vector<8x128xf32>
    %111 = math.exp %110 : vector<8x128xf32>
    %cst_54 = arith.constant 2.000000e+00 : f32
    %112 = vector.broadcast %cst_54 : f32 to vector<8x128xf32>
    %113 = arith.addf %111, %112 : vector<8x128xf32>
    %114 = arith.mulf %111, %113 : vector<8x128xf32>
    %115 = arith.mulf %108, %114 : vector<8x128xf32>
    %cst_55 = arith.constant 2.000000e+00 : f32
    %116 = vector.broadcast %cst_55 : f32 to vector<8x128xf32>
    %117 = arith.addf %114, %116 : vector<8x128xf32>
    %118 = tpu.reciprocal %117 {approx = true} : vector<8x128xf32> -> vector<8x128xf32>
    %119 = arith.mulf %115, %118 : vector<8x128xf32>
    %c0_56 = arith.constant 0 : index
    %c0_57 = arith.constant 0 : index
    %120 = vector.load %arg19[%c0_56, %c0_57] : memref<128x128xbf16, #tpu.memory_space<vmem>>, vector<128x128xbf16>
    %c0_58 = arith.constant 0 : index
    %c0_59 = arith.constant 0 : index
    %121 = vector.load %arg20[%c0_58, %c0_59] : memref<1x128xf32, #tpu.memory_space<vmem>>, vector<1x128xf32>
    %122 = arith.truncf %119 : vector<8x128xf32> to vector<8x128xbf16>
    %cst_60 = arith.constant dense<0.000000e+00> : vector<8x128xf32>
    %123 = tpu.matmul %122, %120, %cst_60 {dimension_numbers = #tpu.dot_dimension_numbers<[1], [0], [0], [1], [0, 0, 1, 1], [], []>} : vector<8x128xbf16>, vector<128x128xbf16>, vector<8x128xf32> -> vector<8x128xf32>
    %124 = vector.broadcast %121 : vector<1x128xf32> to vector<8x128xf32>
    %125 = arith.addf %123, %124 : vector<8x128xf32>
    %c0_61 = arith.constant 0 : index
    %c0_62 = arith.constant 0 : index
    %126 = vector.load %arg2[%c0_61, %c0_62] : memref<8x128xf32, #tpu.memory_space<vmem>>, vector<8x128xf32>
    %c0_63 = arith.constant 0 : index
    %c0_64 = arith.constant 0 : index
    %127 = vector.load %arg3[%c0_63, %c0_64] : memref<1x128xf32, #tpu.memory_space<vmem>>, vector<1x128xf32>
    %128 = vector.broadcast %127 : vector<1x128xf32> to vector<8x128xf32>
    %129 = arith.mulf %126, %128 : vector<8x128xf32>
    %130 = arith.addf %129, %125 : vector<8x128xf32>
    %131 = arith.mulf %126, %126 : vector<8x128xf32>
    %cst_65 = arith.constant dense<0.000000e+00> : vector<8xf32>
    %132 = vector.multi_reduction <add>, %131, %cst_65 [1] : vector<8x128xf32> to vector<8xf32>
    %133 = vector.shape_cast %132 : vector<8xf32> to vector<8x1xf32>
    %cst_66 = arith.constant -5.000000e-01 : f32
    %134 = vector.broadcast %cst_66 : f32 to vector<8x1xf32>
    %135 = arith.mulf %134, %133 : vector<8x1xf32>
    %c0_67 = arith.constant 0 : index
    %136 = memref.load %arg4[%c0_67] : memref<1xf32, #tpu.memory_space<smem>>
    %137 = vector.broadcast %136 : f32 to vector<8x1xf32>
    %138 = arith.subf %135, %137 : vector<8x1xf32>
    %139 = tpu.iota {dimensions = array<i32: 1>} : vector<8x128xi32>
    %c8_i32 = arith.constant 8 : i32
    %140 = vector.broadcast %c8_i32 : i32 to vector<8x128xi32>
    %141 = arith.cmpi eq, %139, %140 : vector<8x128xi32>
    %142 = vector.shape_cast %138 : vector<8x1xf32> to vector<8x1xf32>
    %143 = vector.broadcast %142 : vector<8x1xf32> to vector<8x128xf32>
    %144 = arith.select %141, %143, %125 : vector<8x128xi1>, vector<8x128xf32>
    %c0_68 = arith.constant 0 : index
    %c0_69 = arith.constant 0 : index
    %145 = vector.load %arg21[%c0_68, %c0_69] : memref<8x256xf32, #tpu.memory_space<vmem>>, vector<8x128xf32>
    tpu.vector_store %arg21[%c0_68, %c0_69], %130 {strides = array<i32>} : memref<8x256xf32, #tpu.memory_space<vmem>>, vector<8x128xf32>,
    %c0_70 = arith.constant 0 : index
    %c128 = arith.constant 128 : index
    %146 = vector.load %arg21[%c0_70, %c128] : memref<8x256xf32, #tpu.memory_space<vmem>>, vector<8x128xf32>
    tpu.vector_store %arg21[%c0_70, %c128], %144 {strides = array<i32>} : memref<8x256xf32, #tpu.memory_space<vmem>>, vector<8x128xf32>,
    return
  }
  func.func @transform_0(%arg0: i32) -> (i32, i32) {
    %c0_i32 = arith.constant 0 : i32
    %c0_i32_0 = arith.constant 0 : i32
    return %arg0, %c0_i32 : i32, i32
  }
  func.func @transform_1(%arg0: i32) -> (i32, i32) {
    %c0_i32 = arith.constant 0 : i32
    %c0_i32_0 = arith.constant 0 : i32
    return %arg0, %c0_i32 : i32, i32
  }
  func.func @transform_2(%arg0: i32) -> (i32, i32) {
    %c0_i32 = arith.constant 0 : i32
    %c0_i32_0 = arith.constant 0 : i32
    %c0_i32_1 = arith.constant 0 : i32
    return %c0_i32, %c0_i32_0 : i32, i32
  }
  func.func @transform_3(%arg0: i32) -> i32 {
    %c0_i32 = arith.constant 0 : i32
    %c0_i32_0 = arith.constant 0 : i32
    return %c0_i32 : i32
  }
  func.func @transform_4(%arg0: i32) -> (i32, i32) {
    %c0_i32 = arith.constant 0 : i32
    %c0_i32_0 = arith.constant 0 : i32
    %c0_i32_1 = arith.constant 0 : i32
    return %c0_i32, %c0_i32_0 : i32, i32
  }
  func.func @transform_5(%arg0: i32) -> (i32, i32) {
    %c0_i32 = arith.constant 0 : i32
    %c0_i32_0 = arith.constant 0 : i32
    %c0_i32_1 = arith.constant 0 : i32
    return %c0_i32, %c0_i32_0 : i32, i32
  }
  func.func @transform_6(%arg0: i32) -> (i32, i32) {
    %c0_i32 = arith.constant 0 : i32
    %c0_i32_0 = arith.constant 0 : i32
    %c0_i32_1 = arith.constant 0 : i32
    return %c0_i32, %c0_i32_0 : i32, i32
  }
  func.func @transform_7(%arg0: i32) -> (i32, i32) {
    %c0_i32 = arith.constant 0 : i32
    %c0_i32_0 = arith.constant 0 : i32
    %c0_i32_1 = arith.constant 0 : i32
    return %c0_i32, %c0_i32_0 : i32, i32
  }
  func.func @transform_8(%arg0: i32) -> (i32, i32) {
    %c0_i32 = arith.constant 0 : i32
    %c0_i32_0 = arith.constant 0 : i32
    %c0_i32_1 = arith.constant 0 : i32
    return %c0_i32, %c0_i32_0 : i32, i32
  }
  func.func @transform_9(%arg0: i32) -> (i32, i32) {
    %c0_i32 = arith.constant 0 : i32
    %c0_i32_0 = arith.constant 0 : i32
    %c0_i32_1 = arith.constant 0 : i32
    return %c0_i32, %c0_i32_0 : i32, i32
  }
  func.func @transform_10(%arg0: i32) -> (i32, i32) {
    %c0_i32 = arith.constant 0 : i32
    %c0_i32_0 = arith.constant 0 : i32
    %c0_i32_1 = arith.constant 0 : i32
    return %c0_i32, %c0_i32_0 : i32, i32
  }
  func.func @transform_11(%arg0: i32) -> (i32, i32) {
    %c0_i32 = arith.constant 0 : i32
    %c0_i32_0 = arith.constant 0 : i32
    %c0_i32_1 = arith.constant 0 : i32
    return %c0_i32, %c0_i32_0 : i32, i32
  }
  func.func @transform_12(%arg0: i32) -> (i32, i32) {
    %c0_i32 = arith.constant 0 : i32
    %c0_i32_0 = arith.constant 0 : i32
    %c0_i32_1 = arith.constant 0 : i32
    return %c0_i32, %c0_i32_0 : i32, i32
  }
  func.func @transform_13(%arg0: i32) -> (i32, i32) {
    %c0_i32 = arith.constant 0 : i32
    %c0_i32_0 = arith.constant 0 : i32
    %c0_i32_1 = arith.constant 0 : i32
    return %c0_i32, %c0_i32_0 : i32, i32
  }
  func.func @transform_14(%arg0: i32) -> (i32, i32) {
    %c0_i32 = arith.constant 0 : i32
    %c0_i32_0 = arith.constant 0 : i32
    %c0_i32_1 = arith.constant 0 : i32
    return %c0_i32, %c0_i32_0 : i32, i32
  }
  func.func @transform_15(%arg0: i32) -> (i32, i32) {
    %c0_i32 = arith.constant 0 : i32
    %c0_i32_0 = arith.constant 0 : i32
    %c0_i32_1 = arith.constant 0 : i32
    return %c0_i32, %c0_i32_0 : i32, i32
  }
  func.func @transform_16(%arg0: i32) -> (i32, i32) {
    %c0_i32 = arith.constant 0 : i32
    %c0_i32_0 = arith.constant 0 : i32
    %c0_i32_1 = arith.constant 0 : i32
    return %c0_i32, %c0_i32_0 : i32, i32
  }
  func.func @transform_17(%arg0: i32) -> (i32, i32) {
    %c0_i32 = arith.constant 0 : i32
    %c0_i32_0 = arith.constant 0 : i32
    %c0_i32_1 = arith.constant 0 : i32
    return %c0_i32, %c0_i32_0 : i32, i32
  }
  func.func @transform_18(%arg0: i32) -> (i32, i32) {
    %c0_i32 = arith.constant 0 : i32
    %c0_i32_0 = arith.constant 0 : i32
    %c0_i32_1 = arith.constant 0 : i32
    return %c0_i32, %c0_i32_0 : i32, i32
  }
  func.func @transform_19(%arg0: i32) -> (i32, i32) {
    %c0_i32 = arith.constant 0 : i32
    %c0_i32_0 = arith.constant 0 : i32
    %c0_i32_1 = arith.constant 0 : i32
    return %c0_i32, %c0_i32_0 : i32, i32
  }
  func.func @transform_20(%arg0: i32) -> (i32, i32) {
    %c0_i32 = arith.constant 0 : i32
    %c0_i32_0 = arith.constant 0 : i32
    return %arg0, %c0_i32 : i32, i32
  }
}

</mosaic_0001>

<bundles_post_ra>
// kernel: tpu_custom_call.1
= control target key start
LH: loop header
LB: loop body
LE: loop exit
PB: predicated region body
PF: predicated region fallthrough
CT: control target
= control target key end

     0   :  { %s2575_s0 = inlined_call_operand.hbm [shape: f32[8,128], index: 0, kind: input, shape index: {}]   ;;  %s2576_s1 = inlined_call_operand.hbm [shape: f32[8,128], index: 1, kind: input, shape index: {}]   ;;  %s2577_s2 = inlined_call_operand.vmem [shape: f32[1,128], index: 2, kind: input, shape index: {}]   ;;  %s2578_s3 = inlined_call_operand.<no memory space> [shape: f32[1], index: 3, kind: input, shape index: {}]   ;;  %s2579_s4 = inlined_call_operand.hbm [shape: bf16[128,128], index: 4, kind: input, shape index: {}]   ;;  %s2580_s5 = inlined_call_operand.vmem [shape: f32[1,128], index: 5, kind: input, shape index: {}]   ;;  %s2581_s6 = inlined_call_operand.hbm [shape: bf16[128,128], index: 6, kind: input, shape index: {}]   ;;  %s2582_s7 = inlined_call_operand.hbm [shape: f32[1,128], index: 7, kind: input, shape index: {}]   ;;  %s2583_s8 = inlined_call_operand.hbm [shape: bf16[128,128], index: 8, kind: input, shape index: {}]   ;;  %s2584_s9 = inlined_call_operand.hbm [shape: f32[1,128], index: 9, kind: input, shape index: {}]   ;;  %s2585_s10 = inlined_call_operand.hbm [shape: bf16[128,256], index: 10, kind: input, shape index: {}]   ;;  %s2586_s11 = inlined_call_operand.vmem [shape: f32[1,256], index: 11, kind: input, shape index: {}]   ;;  %s2587_s12 = inlined_call_operand.hbm [shape: bf16[256,128], index: 12, kind: input, shape index: {}]   ;;  %s2588_s13 = inlined_call_operand.hbm [shape: f32[1,128], index: 13, kind: input, shape index: {}]   ;;  %s2589_s14 = inlined_call_operand.hbm [shape: bf16[128,128], index: 14, kind: input, shape index: {}]   ;;  %s2590_s15 = inlined_call_operand.hbm [shape: f32[1,128], index: 15, kind: input, shape index: {}]   ;;  %s2591_s16 = inlined_call_operand.hbm [shape: bf16[128,128], index: 16, kind: input, shape index: {}]   ;;  %s2592_s17 = inlined_call_operand.hbm [shape: f32[1,128], index: 17, kind: input, shape index: {}]   ;;  %s2593_s18 = inlined_call_operand.vmem [shape: bf16[128,128], index: 18, kind: input, shape index: {}]   ;;  %s2594_s19 = inlined_call_operand.vmem [shape: f32[1,128], index: 19, kind: input, shape index: {}]   ;;  %s2595_s20 = inlined_call_operand.hbm [shape: f32[8,256], index: 20, kind: output, shape index: {}]  }
   0x1   :  { %2601 = sst [smem:[#allocation36_spill]] %s2575_s0 }
   0x2   :  { %2602 = sst [smem:[#allocation37_spill]] %s2576_s1 }
   0x3   :  { %2603 = sst [smem:[#allocation38_spill]] %s2577_s2 }
   0x4   :  { %2604 = sst [smem:[#allocation39_spill]] %s2578_s3 }
   0x5   :  { %2605 = sst [smem:[#allocation40_spill]] %s2579_s4 }
   0x6   :  { %26 = vsyncpa [#allocation4], 0 }
   0x7   :  { %27 = vsyncpa [#allocation7], 0 }
   0x8   :  { %28 = vsyncpa [#allocation10], 0 }
   0x9   :  { %29 = vsyncpa [#allocation13], 0 }
   0xa   :  { %30 = vsyncpa [#allocation16], 0 }
   0xb   :  { %31 = vsyncpa [#allocation19], 0 }
   0xc   :  { %32 = vsyncpa [#allocation22], 0 }
   0xd   :  { %33 = vsyncpa [#allocation25], 0 }
   0xe   :  { %34 = vsyncpa [#allocation5], 0  ;;  %s2135_s1 = smov [#allocation6]   ;;  %s2606_s2 = sld [smem:[#allocation37_spill]] }
   0xf   :  { %s51_s22 = sshll.u32 %s2135_s1, 4  ;;  %s52_s22 = int_to_ptr.vmem [resolvable:$true] %s51_s22 }
  0x14   :  { %s1787_s25 = scalar_lea.hbm %s2606_s2, 128 }
  0x15   :  { %p1788_p0 = scmp.ne.s32.totalorder %s2606_s2, %s1787_s25  ;;  %p1791_p1 = scmp.lt.u32.totalorder %s1787_s25, %s2606_s2 }
  0x17   :  { %p1793_p2 = pnand %p1791_p1, %p1788_p0 }
  0x19   :  { %1796 = shalt.err (!%p1793_p2)
}
  0x1a   :  { %s1797_s4 = scalar_lea.vmem %s52_s22, 128  ;;  %p1802_p4 = scmp.lt.s32.totalorder %s52_s22, %s52_s22 }
  0x1b   :  { %p1798_p3 = scmp.ne.s32.totalorder %s52_s22, %s1797_s4  ;;  %p1803_p5 = scmp.lt.s32.totalorder %s1797_s4, %s1797_s4 }
  0x1d   :  { %p1804_p6 = por %p1803_p5, %p1802_p4 }
  0x1f   :  { %p1805_p7 = pnand %p1804_p6, %p1798_p3 }
  0x21   :  { %1808 = shalt.err (!%p1805_p7)
}
  0x22   :  { %54 = dma.hbm_to_vmem [thread:$0]  %s2606_s2, 128, %s52_s22, [#allocation7]  }
  0x23   :  { %s2136_s0 = smov [#allocation9]   ;;  %s2137_s1 = smov [#allocation12]  }
  0x24   :  { %s78_s21 = sshll.u32 %s2136_s0, 4  ;;  %s100_s23 = sshll.u32 %s2137_s1, 4  ;;  %s79_s21 = int_to_ptr.vmem [resolvable:$true] %s78_s21  ;;  %s101_s23 = int_to_ptr.vmem [resolvable:$true] %s100_s23 }
  0x25   :  { %s1809_s3 = scalar_lea.hbm %s2581_s6, 1024 }
  0x26   :  { %p1810_p8 = scmp.ne.s32.totalorder %s2581_s6, %s1809_s3  ;;  %p1813_p9 = scmp.lt.u32.totalorder %s1809_s3, %s2581_s6 }
  0x28   :  { %p1815_p10 = pnand %p1813_p9, %p1810_p8 }
  0x2a   :  { %1818 = shalt.err (!%p1815_p10)
}
  0x2b   :  { %s1819_s22 = scalar_lea.vmem %s79_s21, 1024  ;;  %p1824_p12 = scmp.lt.s32.totalorder %s79_s21, %s79_s21 }
  0x2c   :  { %p1820_p11 = scmp.ne.s32.totalorder %s79_s21, %s1819_s22  ;;  %p1825_p13 = scmp.lt.s32.totalorder %s1819_s22, %s1819_s22 }
  0x2e   :  { %p1826_p0 = por %p1825_p13, %p1824_p12 }
  0x30   :  { %p1827_p1 = pnand %p1826_p0, %p1820_p11 }
  0x32   :  { %1830 = shalt.err (!%p1827_p1)
}
  0x33   :  { %s2599_s2 = smov 64   ;;  %s2139_s29 = smov 4  }
  0x34   :  { %84 = dma.hbm_to_vmem [thread:$0]  %s2581_s6, 1024, %s79_s21, [#allocation10], %s2599_s2, %s2599_s2, %s2139_s29  }
  0x35   :  { %s1831_s25 = scalar_lea.hbm %s2583_s8, 1024 }
  0x36   :  { %p1832_p2 = scmp.ne.s32.totalorder %s2583_s8, %s1831_s25  ;;  %p1835_p3 = scmp.lt.u32.totalorder %s1831_s25, %s2583_s8 }
  0x38   :  { %p1837_p4 = pnand %p1835_p3, %p1832_p2 }
  0x3a   :  { %1840 = shalt.err (!%p1837_p4)
}
  0x3b   :  { %s1841_s4 = scalar_lea.vmem %s101_s23, 1024  ;;  %p1846_p6 = scmp.lt.s32.totalorder %s101_s23, %s101_s23 }
  0x3c   :  { %p1842_p5 = scmp.ne.s32.totalorder %s101_s23, %s1841_s4  ;;  %p1847_p7 = scmp.lt.s32.totalorder %s1841_s4, %s1841_s4 }
  0x3e   :  { %p1848_p8 = por %p1847_p7, %p1846_p6 }
  0x40   :  { %p1849_p9 = pnand %p1848_p8, %p1842_p5 }
  0x42   :  { %1852 = shalt.err (!%p1849_p9)
}
  0x43   :  { %106 = dma.hbm_to_vmem [thread:$0]  %s2583_s8, 1024, %s101_s23, [#allocation13], %s2599_s2, %s2599_s2, %s2139_s29  }
  0x44   :  { %s2140_s22 = smov [#allocation15]   ;;  %s1853_s24 = scalar_lea.hbm %s2585_s10, 2048 }
  0x45   :  { %s122_s30 = sshll.u32 %s2140_s22, 4  ;;  %p1854_p10 = scmp.ne.s32.totalorder %s2585_s10, %s1853_s24  ;;  %s123_s30 = int_to_ptr.vmem [resolvable:$true] %s122_s30 }
  0x46   :  { %p1857_p11 = scmp.lt.u32.totalorder %s1853_s24, %s2585_s10 }
  0x48   :  { %p1859_p12 = pnand %p1857_p11, %p1854_p10 }
  0x4a   :  { %1862 = shalt.err (!%p1859_p12)
}
  0x4b   :  { %s1863_s28 = scalar_lea.vmem %s123_s30, 2048  ;;  %p1868_p0 = scmp.lt.s32.totalorder %s123_s30, %s123_s30 }
  0x4c   :  { %p1864_p13 = scmp.ne.s32.totalorder %s123_s30, %s1863_s28  ;;  %p1869_p1 = scmp.lt.s32.totalorder %s1863_s28, %s1863_s28 }
  0x4e   :  { %p1870_p2 = por %p1869_p1, %p1868_p0 }
  0x50   :  { %p1871_p3 = pnand %p1870_p2, %p1864_p13 }
  0x52   :  { %1874 = shalt.err (!%p1871_p3)
}
  0x53   :  { %s2141_s8 = smov 128   ;;  %s2142_s23 = smov 8  }
  0x54   :  { %128 = dma.hbm_to_vmem [thread:$0]  %s2585_s10, 2048, %s123_s30, [#allocation16], %s2141_s8, %s2141_s8, %s2142_s23  }
  0x55   :  { %s2143_s21 = smov [#allocation18]   ;;  %s2144_s0 = smov [#allocation21]  }
  0x56   :  { %s149_s22 = sshll.u32 %s2143_s21, 4  ;;  %s171_s1 = sshll.u32 %s2144_s0, 4  ;;  %s150_s22 = int_to_ptr.vmem [resolvable:$true] %s149_s22  ;;  %s172_s1 = int_to_ptr.vmem [resolvable:$true] %s171_s1 }
  0x57   :  { %s1875_s3 = scalar_lea.hbm %s2588_s13, 16 }
  0x58   :  { %p1876_p4 = scmp.ne.s32.totalorder %s2588_s13, %s1875_s3  ;;  %p1879_p5 = scmp.lt.u32.totalorder %s1875_s3, %s2588_s13 }
  0x5a   :  { %p1881_p6 = pnand %p1879_p5, %p1876_p4 }
  0x5c   :  { %1884 = shalt.err (!%p1881_p6)
}
  0x5d   :  { %s1885_s10 = scalar_lea.vmem %s150_s22, 16  ;;  %s1889_s30 = scalar_lea.vmem %s150_s22, 32 }
  0x5e   :  { %p1886_p7 = scmp.ne.s32.totalorder %s150_s22, %s1885_s10  ;;  %p1890_p8 = scmp.lt.s32.totalorder %s150_s22, %s150_s22 }
  0x5f   :  { %p1891_p9 = scmp.lt.s32.totalorder %s1889_s30, %s1885_s10 }
  0x61   :  { %p1892_p10 = por %p1891_p9, %p1890_p8 }
  0x63   :  { %p1893_p11 = pnand %p1892_p10, %p1886_p7 }
  0x65   :  { %1896 = shalt.err (!%p1893_p11)
}
  0x66   :  { %152 = dma.hbm_to_vmem [thread:$0]  %s2588_s13, 16, %s150_s22, [#allocation19]  }
  0x67   :  { %s1897_s21 = scalar_lea.hbm %s2590_s15, 16 }
  0x68   :  { %p1898_p12 = scmp.ne.s32.totalorder %s2590_s15, %s1897_s21  ;;  %p1901_p13 = scmp.lt.u32.totalorder %s1897_s21, %s2590_s15 }
  0x6a   :  { %p1903_p0 = pnand %p1901_p13, %p1898_p12 }
  0x6c   :  { %1906 = shalt.err (!%p1903_p0)
}
  0x6d   :  { %s1907_s3 = scalar_lea.vmem %s172_s1, 16  ;;  %s1911_s26 = scalar_lea.vmem %s172_s1, 32 }
  0x6e   :  { %p1908_p1 = scmp.ne.s32.totalorder %s172_s1, %s1907_s3  ;;  %p1912_p2 = scmp.lt.s32.totalorder %s172_s1, %s172_s1 }
  0x6f   :  { %p1913_p3 = scmp.lt.s32.totalorder %s1911_s26, %s1907_s3 }
  0x71   :  { %p1914_p4 = por %p1913_p3, %p1912_p2 }
  0x73   :  { %p1915_p5 = pnand %p1914_p4, %p1908_p1 }
  0x75   :  { %1918 = shalt.err (!%p1915_p5)
}
  0x76   :  { %174 = dma.hbm_to_vmem [thread:$0]  %s2590_s15, 16, %s172_s1, [#allocation22]  }
  0x77   :  { %s2145_s27 = smov [#allocation3]   ;;  %s2146_s10 = smov [#allocation8]  }
  0x78   :  { %s41_s28 = sshll.u32 %s2145_s27, 4  ;;  %s64_s30 = sshll.u32 %s2146_s10, 4  ;;  %s42_s28 = int_to_ptr.vmem [resolvable:$true] %s41_s28  ;;  %s2340_s30 = int_to_ptr.vmem [resolvable:$true] %s64_s30 }
  0x79   :  { %s2607_s4 = sld [smem:[#allocation36_spill]] }
  0x7f   :  { %s1919_s6 = scalar_lea.hbm %s2607_s4, 128 }
  0x80   :  { %p1920_p6 = scmp.ne.s32.totalorder %s2607_s4, %s1919_s6  ;;  %p1923_p7 = scmp.lt.u32.totalorder %s1919_s6, %s2607_s4 }
  0x82   :  { %p1925_p8 = pnand %p1923_p7, %p1920_p6 }
  0x84   :  { %1928 = shalt.err (!%p1925_p8)
}
  0x85   :  { %s1929_s15 = scalar_lea.vmem %s42_s28, 128  ;;  %p1934_p10 = scmp.lt.s32.totalorder %s42_s28, %s42_s28 }
  0x86   :  { %p1930_p9 = scmp.ne.s32.totalorder %s42_s28, %s1929_s15  ;;  %p1935_p11 = scmp.lt.s32.totalorder %s1929_s15, %s1929_s15 }
  0x88   :  { %p1936_p12 = por %p1935_p11, %p1934_p10 }
  0x8a   :  { %p1937_p13 = pnand %p1936_p12, %p1930_p9 }
  0x8c   :  { %1940 = shalt.err (!%p1937_p13)
}
  0x8d   :  { %44 = dma.hbm_to_vmem [thread:$0]  %s2607_s4, 128, %s42_s28, [#allocation4]  }
  0x8e   :  { %s2608_s13 = sld [smem:[#allocation40_spill]] }
  0x94   :  { %s1941_s22 = scalar_lea.hbm %s2608_s13, 1024 }
  0x95   :  { %p1942_p0 = scmp.ne.s32.totalorder %s2608_s13, %s1941_s22  ;;  %p1945_p1 = scmp.lt.u32.totalorder %s1941_s22, %s2608_s13 }
  0x97   :  { %p1947_p2 = pnand %p1945_p1, %p1942_p0 }
  0x99   :  { %1950 = shalt.err (!%p1947_p2)
}
  0x9a   :  { %s1951_s6 = scalar_lea.vmem %s2340_s30, 1024  ;;  %p1956_p4 = scmp.lt.s32.totalorder %s2340_s30, %s2340_s30 }
  0x9b   :  { %p1952_p3 = scmp.ne.s32.totalorder %s2340_s30, %s1951_s6  ;;  %p1957_p5 = scmp.lt.s32.totalorder %s1951_s6, %s1951_s6 }
  0x9d   :  { %p1958_p6 = por %p1957_p5, %p1956_p4 }
  0x9f   :  { %p1959_p7 = pnand %p1958_p6, %p1952_p3 }
  0xa1   :  { %1962 = shalt.err (!%p1959_p7)
}
  0xa2   :  { %s2609_s28 = smov 64   ;;  %s2147_s2 = smov [#allocation11]  }
  0xa3   :  { %70 = dma.hbm_to_vmem [thread:$0]  %s2608_s13, 1024, %s2340_s30, [#allocation7], %s2609_s28, %s2609_s28, %s2139_s29  }
  0xa4   :  { %s91_s0 = sshll.u32 %s2147_s2, 4  ;;  %s2148_s24 = smov [#allocation14]   ;;  %s92_s0 = int_to_ptr.vmem [resolvable:$true] %s91_s0 }
  0xa5   :  { %s113_s15 = sshll.u32 %s2148_s24, 4  ;;  %s1963_s3 = scalar_lea.hbm %s2582_s7, 16  ;;  %s114_s15 = int_to_ptr.vmem [resolvable:$true] %s113_s15 }
  0xa6   :  { %p1964_p8 = scmp.ne.s32.totalorder %s2582_s7, %s1963_s3  ;;  %p1967_p9 = scmp.lt.u32.totalorder %s1963_s3, %s2582_s7 }
  0xa8   :  { %p1969_p10 = pnand %p1967_p9, %p1964_p8 }
  0xaa   :  { %1972 = shalt.err (!%p1969_p10)
}
  0xab   :  { %s1973_s30 = scalar_lea.vmem %s92_s0, 16  ;;  %s1977_s13 = scalar_lea.vmem %s92_s0, 32 }
  0xac   :  { %p1974_p11 = scmp.ne.s32.totalorder %s92_s0, %s1973_s30  ;;  %p1978_p12 = scmp.lt.s32.totalorder %s92_s0, %s92_s0 }
  0xad   :  { %p1979_p13 = scmp.lt.s32.totalorder %s1977_s13, %s1973_s30 }
  0xaf   :  { %p1980_p0 = por %p1979_p13, %p1978_p12 }
  0xb1   :  { %p1981_p1 = pnand %p1980_p0, %p1974_p11 }
  0xb3   :  { %1984 = shalt.err (!%p1981_p1)
}
  0xb4   :  { %94 = dma.hbm_to_vmem [thread:$0]  %s2582_s7, 16, %s92_s0, [#allocation10]  }
  0xb5   :  { %s1985_s21 = scalar_lea.hbm %s2584_s9, 16 }
  0xb6   :  { %p1986_p2 = scmp.ne.s32.totalorder %s2584_s9, %s1985_s21  ;;  %p1989_p3 = scmp.lt.u32.totalorder %s1985_s21, %s2584_s9 }
  0xb8   :  { %p1991_p4 = pnand %p1989_p3, %p1986_p2 }
  0xba   :  { %1994 = shalt.err (!%p1991_p4)
}
  0xbb   :  { %s1995_s3 = scalar_lea.vmem %s114_s15, 16  ;;  %s1999_s26 = scalar_lea.vmem %s114_s15, 32 }
  0xbc   :  { %p1996_p5 = scmp.ne.s32.totalorder %s114_s15, %s1995_s3  ;;  %p2000_p6 = scmp.lt.s32.totalorder %s114_s15, %s114_s15 }
  0xbd   :  { %p2001_p7 = scmp.lt.s32.totalorder %s1999_s26, %s1995_s3 }
  0xbf   :  { %p2002_p8 = por %p2001_p7, %p2000_p6 }
  0xc1   :  { %p2003_p9 = pnand %p2002_p8, %p1996_p5 }
  0xc3   :  { %2006 = shalt.err (!%p2003_p9)
}
  0xc4   :  { %116 = dma.hbm_to_vmem [thread:$0]  %s2584_s9, 16, %s114_s15, [#allocation13]  }
  0xc5   :  { %s2149_s22 = smov [#allocation17]   ;;  %s2150_s10 = smov [#allocation20]  }
  0xc6   :  { %s136_s27 = sshll.u32 %s2149_s22, 4  ;;  %s158_s30 = sshll.u32 %s2150_s10, 4  ;;  %s137_s27 = int_to_ptr.vmem [resolvable:$true] %s136_s27  ;;  %s2398_s30 = int_to_ptr.vmem [resolvable:$true] %s158_s30 }
  0xc7   :  { %s2007_s23 = scalar_lea.hbm %s2587_s12, 2048 }
  0xc8   :  { %p2008_p10 = scmp.ne.s32.totalorder %s2587_s12, %s2007_s23  ;;  %p2011_p11 = scmp.lt.u32.totalorder %s2007_s23, %s2587_s12 }
  0xca   :  { %p2013_p12 = pnand %p2011_p11, %p2008_p10 }
  0xcc   :  { %2016 = shalt.err (!%p2013_p12)
}
  0xcd   :  { %s2017_s9 = scalar_lea.vmem %s137_s27, 2048  ;;  %p2022_p0 = scmp.lt.s32.totalorder %s137_s27, %s137_s27 }
  0xce   :  { %p2018_p13 = scmp.ne.s32.totalorder %s137_s27, %s2017_s9  ;;  %p2023_p1 = scmp.lt.s32.totalorder %s2017_s9, %s2017_s9 }
  0xd0   :  { %p2024_p2 = por %p2023_p1, %p2022_p0 }
  0xd2   :  { %p2025_p3 = pnand %p2024_p2, %p2018_p13 }
  0xd4   :  { %2028 = shalt.err (!%p2025_p3)
}
  0xd5   :  { %142 = dma.hbm_to_vmem [thread:$0]  %s2587_s12, 2048, %s137_s27, [#allocation16], %s2609_s28, %s2609_s28, %s2139_s29  }
  0xd6   :  { %s2029_s3 = scalar_lea.hbm %s2589_s14, 1024 }
  0xd7   :  { %p2030_p4 = scmp.ne.s32.totalorder %s2589_s14, %s2029_s3  ;;  %p2033_p5 = scmp.lt.u32.totalorder %s2029_s3, %s2589_s14 }
  0xd9   :  { %p2035_p6 = pnand %p2033_p5, %p2030_p4 }
  0xdb   :  { %2038 = shalt.err (!%p2035_p6)
}
  0xdc   :  { %s2039_s10 = scalar_lea.vmem %s2398_s30, 1024  ;;  %p2044_p8 = scmp.lt.s32.totalorder %s2398_s30, %s2398_s30 }
  0xdd   :  { %p2040_p7 = scmp.ne.s32.totalorder %s2398_s30, %s2039_s10  ;;  %p2045_p9 = scmp.lt.s32.totalorder %s2039_s10, %s2039_s10 }
  0xdf   :  { %p2046_p10 = por %p2045_p9, %p2044_p8 }
  0xe1   :  { %p2047_p11 = pnand %p2046_p10, %p2040_p7 }
  0xe3   :  { %2050 = shalt.err (!%p2047_p11)
}
  0xe4   :  { %164 = dma.hbm_to_vmem [thread:$0]  %s2589_s14, 1024, %s2398_s30, [#allocation19], %s2609_s28, %s2609_s28, %s2139_s29  }
  0xe5   :  { %s2151_s13 = smov [#allocation23]   ;;  %s2152_s23 = smov [#allocation24]  }
  0xe6   :  { %s180_s8 = sshll.u32 %s2151_s13, 4  ;;  %s193_s6 = sshll.u32 %s2152_s23, 4  ;;  %s181_s8 = int_to_ptr.vmem [resolvable:$true] %s180_s8  ;;  %s194_s6 = int_to_ptr.vmem [resolvable:$true] %s193_s6 }
  0xe7   :  { %s2051_s2 = scalar_lea.hbm %s2591_s16, 1024 }
  0xe8   :  { %p2052_p12 = scmp.ne.s32.totalorder %s2591_s16, %s2051_s2  ;;  %p2055_p13 = scmp.lt.u32.totalorder %s2051_s2, %s2591_s16 }
  0xea   :  { %p2057_p0 = pnand %p2055_p13, %p2052_p12 }
  0xec   :  { %2060 = shalt.err (!%p2057_p0)
}
  0xed   :  { %s2061_s14 = scalar_lea.vmem %s181_s8, 1024  ;;  %p2066_p2 = scmp.lt.s32.totalorder %s181_s8, %s181_s8 }
  0xee   :  { %p2062_p1 = scmp.ne.s32.totalorder %s181_s8, %s2061_s14  ;;  %p2067_p3 = scmp.lt.s32.totalorder %s2061_s14, %s2061_s14 }
  0xf0   :  { %p2068_p4 = por %p2067_p3, %p2066_p2 }
  0xf2   :  { %p2069_p5 = pnand %p2068_p4, %p2062_p1 }
  0xf4   :  { %2072 = shalt.err (!%p2069_p5)
}
  0xf5   :  { %186 = dma.hbm_to_vmem [thread:$0]  %s2591_s16, 1024, %s181_s8, [#allocation22], %s2609_s28, %s2609_s28, %s2139_s29  }
  0xf6   :  { %s2073_s7 = scalar_lea.hbm %s2592_s17, 16 }
  0xf7   :  { %p2074_p6 = scmp.ne.s32.totalorder %s2592_s17, %s2073_s7  ;;  %p2077_p7 = scmp.lt.u32.totalorder %s2073_s7, %s2592_s17 }
  0xf9   :  { %p2079_p8 = pnand %p2077_p7, %p2074_p6 }
  0xfb   :  { %2082 = shalt.err (!%p2079_p8)
}
  0xfc   :  { %s2083_s27 = scalar_lea.vmem %s194_s6, 16  ;;  %s2087_s13 = scalar_lea.vmem %s194_s6, 32 }
  0xfd   :  { %p2084_p9 = scmp.ne.s32.totalorder %s194_s6, %s2083_s27  ;;  %p2088_p10 = scmp.lt.s32.totalorder %s194_s6, %s194_s6 }
  0xfe   :  { %p2089_p11 = scmp.lt.s32.totalorder %s2087_s13, %s2083_s27 }
 0x100   :  { %p2090_p12 = por %p2089_p11, %p2088_p10 }
 0x102   :  { %p2091_p13 = pnand %p2090_p12, %p2084_p9 }
 0x104   :  { %2094 = shalt.err (!%p2091_p13)
}
 0x105   :  { %196 = dma.hbm_to_vmem [thread:$0]  %s2592_s17, 16, %s194_s6, [#allocation25]  }
 0x106   :  { %2117 = dma.done.wait [#allocation4], 128  }
 0x107   :  { %2118 = vsyncadd [#allocation4], 4294967168 }
 0x108   :  { %2119 = dma.done.wait [#allocation7], 1152  }
 0x109   :  { %2120 = vsyncadd [#allocation7], 4294966144 }
 0x10a   :  { %2121 = dma.done.wait [#allocation10], 1040  }
 0x10b   :  { %2122 = vsyncadd [#allocation10], 4294966256 }
 0x10c   :  { %2123 = dma.done.wait [#allocation13], 1040  }
 0x10d   :  { %2124 = vsyncadd [#allocation13], 4294966256 }
 0x10e   :  { %2125 = dma.done.wait [#allocation16], 4096  }
 0x10f   :  { %2126 = vsyncadd [#allocation16], 4294963200 }
 0x110   :  { %2127 = dma.done.wait [#allocation19], 1040  }
 0x111   :  { %2128 = vsyncadd [#allocation19], 4294966256 }
 0x112   :  { %2129 = dma.done.wait [#allocation22], 1040  }
 0x113   :  { %2130 = vsyncadd [#allocation22], 4294966256 }
 0x114   :  { %2131 = dma.done.wait [#allocation25], 16  }
 0x115   :  { %2132 = vsyncadd [#allocation25], 4294967280  ;;  %v2153_v0 = vmov 0.0   ;;  %vm2154_vm0 = vmmov 0   ;;  %v1667_v1 = vld [vmem:[#allocation8] sm:$0xff]   ;;  %v1668_v2 = vld [vmem:[#allocation8 + $0x8] sm:$0xff]  }
 0x116   :  { %1525 = vmatprep.subr.bf16.mxu0 %v2153_v0  ;;  %1541 = vmatprep.mubr.msk.bf16.mxu0 %vm2154_vm0, %v2153_v0  ;;  %v1669_v3 = vld [vmem:[#allocation8 + $0x10] sm:$0xff]   ;;  %v1670_v4 = vld [vmem:[#allocation8 + $0x18] sm:$0xff]   ;;  %v1671_v5 = vld [vmem:[#allocation8 + $0x20] sm:$0xff]   ;;  %s2610_s22 = sld [smem:[#allocation38_spill]]  ;;  %s2611_s27 = sld [smem:[#allocation39_spill]] }
 0x117   :  { %1545 = vmatprep.subr.bf16.mxu1 %v2153_v0  ;;  %1561 = vmatprep.mubr.msk.bf16.mxu1 %vm2154_vm0, %v2153_v0  ;;  %v1672_v6 = vld [vmem:[#allocation8 + $0x28] sm:$0xff]   ;;  %v1673_v7 = vld [vmem:[#allocation8 + $0x30] sm:$0xff]   ;;  %v1674_v8 = vld [vmem:[#allocation8 + $0x38] sm:$0xff]   ;;  %s2156_s29 = smov [#allocation26]  }
 0x118   :  { %1526 = vmatpush3.bf16.msra.mxu0 %v1667_v1  ;;  %v244_v9 = vld [vmem:[#allocation3] sm:$0xff]  ;;  %v1675_v11 = vld [vmem:[#allocation9] sm:$0xff]   ;;  %v1676_v12 = vld [vmem:[#allocation9 + $0x8] sm:$0xff]   ;;  %s1345_s17 = sshll.u32 %s2156_s29, 4  ;;  %s1346_s17 = int_to_ptr.vmem [resolvable:$true] %s1345_s17 }
 0x119   :  { %1527 = vmatprep.subr.bf16.mxu0 %v2153_v0  ;;  %v262_v10 = vpack.c.bf16 %v244_v9, %v244_v9  ;;  %1546 = vmatpush3.bf16.msra.mxu1 %v1675_v11  ;;  %v1677_v13 = vld [vmem:[#allocation9 + $0x10] sm:$0xff]   ;;  %v1678_v14 = vld [vmem:[#allocation9 + $0x18] sm:$0xff]   ;;  %v1679_v15 = vld [vmem:[#allocation9 + $0x20] sm:$0xff]   ;;  %s2095_s28 = scalar_lea.vmem %s1346_s17, 256  ;;  %p2100_p1 = scmp.lt.s32.totalorder %s1346_s17, %s1346_s17 }
 0x11a   :  { %1547 = vmatprep.subr.bf16.mxu1 %v2153_v0  ;;  %v1680_v16 = vld [vmem:[#allocation9 + $0x28] sm:$0xff]   ;;  %v1681_v17 = vld [vmem:[#allocation9 + $0x30] sm:$0xff]   ;;  %v1682_v18 = vld [vmem:[#allocation9 + $0x38] sm:$0xff]   ;;  %p2096_p0 = scmp.ne.s32.totalorder %s1346_s17, %s2095_s28  ;;  %p2101_p2 = scmp.lt.s32.totalorder %s2095_s28, %s2095_s28 }
 0x11b   :  { %v1361_v19 = vld [vmem:[%s2580_s5] ss:$0 sm:$0xff]  ;;  %v1683_v35 = vld [vmem:[#allocation12] sm:$0xff]   ;;  %v1685_v37 = vld [vmem:[#allocation12 + $0x10] sm:$0xff]  }
 0x11c   :  { %1528 = vmatpush3.bf16.msra.mxu0 %v1668_v2  ;;  %v1684_v36 = vld [vmem:[#allocation12 + $0x8] sm:$0xff]   ;;  %v1686_v38 = vld [vmem:[#allocation12 + $0x18] sm:$0xff]   ;;  %v1687_v39 = vld [vmem:[#allocation12 + $0x20] sm:$0xff]   ;;  %p2102_p3 = por %p2101_p2, %p2100_p1 }
 0x11d   :  { %1529 = vmatprep.subr.bf16.mxu0 %v2153_v0  ;;  %1548 = vmatpush3.bf16.msra.mxu1 %v1676_v12  ;;  %v1688_v40 = vld [vmem:[#allocation12 + $0x28] sm:$0xff]   ;;  %v1689_v41 = vld [vmem:[#allocation12 + $0x30] sm:$0xff]   ;;  %v1690_v42 = vld [vmem:[#allocation12 + $0x38] sm:$0xff]   ;;  %v2155_v12 = vmov 0  }
 0x11e   :  { %1549 = vmatprep.subr.bf16.mxu1 %v2153_v0  ;;  %v1370_v43 = vld [vmem:[#allocation11] ss:$0 sm:$0xff]  ;;  %v1693_v59 = vld [vmem:[#allocation15 + $0x4] ss:$8 sps:$4 sm:$0xff]   ;;  %v1691_v60 = vld [vmem:[#allocation15] ss:$8 sps:$4 sm:$0xff]   ;;  %p2103_p4 = pnand %p2102_p3, %p2096_p0 }
 0x11f   :  { %v1696_v61 = vld [vmem:[#allocation15 + $0x14] ss:$8 sps:$4 sm:$0xff]   ;;  %v1694_v62 = vld [vmem:[#allocation15 + $0x10] ss:$8 sps:$4 sm:$0xff]   ;;  %v1699_v63 = vld [vmem:[#allocation15 + $0x24] ss:$8 sps:$4 sm:$0xff]  }
 0x120   :  { %1530 = vmatpush3.bf16.msra.mxu0 %v1669_v3  ;;  %v1697_v1 = vld [vmem:[#allocation15 + $0x20] ss:$8 sps:$4 sm:$0xff]   ;;  %v1702_v2 = vld [vmem:[#allocation15 + $0x34] ss:$8 sps:$4 sm:$0xff]   ;;  %v1700_v3 = vld [vmem:[#allocation15 + $0x30] ss:$8 sps:$4 sm:$0xff]  }
 0x121   :  { %1531 = vmatprep.subr.bf16.mxu0 %v2153_v0  ;;  %1550 = vmatpush3.bf16.msra.mxu1 %v1677_v13  ;;  %v1709_v9 = vld [vmem:[#allocation15 + $0x60] ss:$8 sps:$4 sm:$0xff]   ;;  %v1712_v11 = vld [vmem:[#allocation15 + $0x70] ss:$8 sps:$4 sm:$0xff]   ;;  %v1379_v13 = vld [vmem:[#allocation14] ss:$0 sm:$0xff] }
 0x122   :  { %1551 = vmatprep.subr.bf16.mxu1 %v2153_v0 }
 0x124   :  { %1532 = vmatpush3.bf16.msra.mxu0 %v1670_v4  ;;  %v1705_v4 = vld [vmem:[#allocation15 + $0x44] ss:$8 sps:$4 sm:$0xff]  }
 0x125   :  { %1533 = vmatprep.subr.bf16.mxu0 %v2153_v0  ;;  %1552 = vmatpush3.bf16.msra.mxu1 %v1678_v14 }
 0x126   :  { %1553 = vmatprep.subr.bf16.mxu1 %v2153_v0 }
 0x128   :  { %1534 = vmatpush3.bf16.msra.mxu0 %v1671_v5  ;;  %v1703_v5 = vld [vmem:[#allocation15 + $0x40] ss:$8 sps:$4 sm:$0xff]  }
 0x129   :  { %1535 = vmatprep.subr.bf16.mxu0 %v2153_v0  ;;  %1554 = vmatpush3.bf16.msra.mxu1 %v1679_v15 }
 0x12a   :  { %1555 = vmatprep.subr.bf16.mxu1 %v2153_v0 }
 0x12c   :  { %1536 = vmatpush3.bf16.msra.mxu0 %v1672_v6  ;;  %v1708_v6 = vld [vmem:[#allocation15 + $0x54] ss:$8 sps:$4 sm:$0xff]  }
 0x12d   :  { %1537 = vmatprep.subr.bf16.mxu0 %v2153_v0  ;;  %1556 = vmatpush3.bf16.msra.mxu1 %v1680_v16 }
 0x12e   :  { %1557 = vmatprep.subr.bf16.mxu1 %v2153_v0 }
 0x130   :  { %1538 = vmatpush3.bf16.msra.mxu0 %v1673_v7  ;;  %v1706_v7 = vld [vmem:[#allocation15 + $0x50] ss:$8 sps:$4 sm:$0xff]  }
 0x131   :  { %1539 = vmatprep.subr.bf16.mxu0 %v2153_v0  ;;  %1558 = vmatpush3.bf16.msra.mxu1 %v1681_v17 }
 0x132   :  { %1559 = vmatprep.subr.bf16.mxu1 %v2153_v0 }
 0x134   :  { %1540 = vmatpush3.bf16.msra.mxu0 %v1674_v8  ;;  %v1711_v8 = vld [vmem:[#allocation15 + $0x64] ss:$8 sps:$4 sm:$0xff]  }
 0x135   :  { %1565 = vmatprep.subr.bf16.mxu0 %v2153_v0  ;;  %1560 = vmatpush3.bf16.msra.mxu1 %v1682_v18 }
 0x136   :  { %717 = vmatprep.subr.bf16.mxu1 %v1693_v59 }
 0x137   :  { %1542 = vmatmul.mubr.bf16.vlgmr.msra.gmra.mrb[0].mxu0 %v262_v10  ;;  %v1714_v10 = vld [vmem:[#allocation15 + $0x74] ss:$8 sps:$4 sm:$0xff]  }
 0x138   :  { %1581 = vmatprep.mubr.msk.bf16.mxu0 %vm2154_vm0, %v2153_v0  ;;  %1566 = vmatpush3.bf16.msra.mxu0 %v1683_v35  ;;  %v1721_v35 = vld [vmem:[#allocation17 + $0x58] sm:$0xff]  }
 0x139   :  { %1567 = vmatprep.subr.bf16.mxu0 %v2153_v0 }
 0x13c   :  { %1568 = vmatpush3.bf16.msra.mxu0 %v1684_v36  ;;  %v1722_v36 = vld [vmem:[#allocation17 + $0x18] sm:$0xff]  }
 0x13d   :  { %1569 = vmatprep.subr.bf16.mxu0 %v2153_v0 }
 0x140   :  { %1570 = vmatpush3.bf16.msra.mxu0 %v1685_v37  ;;  %v1723_v37 = vld [vmem:[#allocation17 + $0x60] sm:$0xff]  }
 0x141   :  { %1571 = vmatprep.subr.bf16.mxu0 %v2153_v0 }
 0x144   :  { %1572 = vmatpush3.bf16.msra.mxu0 %v1686_v38  ;;  %v1724_v38 = vld [vmem:[#allocation17 + $0x20] sm:$0xff]  }
 0x145   :  { %1573 = vmatprep.subr.bf16.mxu0 %v2153_v0 }
 0x148   :  { %1574 = vmatpush3.bf16.msra.mxu0 %v1687_v39  ;;  %v1725_v39 = vld [vmem:[#allocation17 + $0x68] sm:$0xff]  }
 0x149   :  { %1575 = vmatprep.subr.bf16.mxu0 %v2153_v0 }
 0x14c   :  { %1576 = vmatpush3.bf16.msra.mxu0 %v1688_v40  ;;  %v1726_v40 = vld [vmem:[#allocation17 + $0x28] sm:$0xff]  }
 0x14d   :  { %1577 = vmatprep.subr.bf16.mxu0 %v2153_v0 }
 0x150   :  { %1578 = vmatpush3.bf16.msra.mxu0 %v1689_v41  ;;  %v1727_v41 = vld [vmem:[#allocation17 + $0x70] sm:$0xff]  }
 0x151   :  { %1579 = vmatprep.subr.bf16.mxu0 %v2153_v0 }
 0x154   :  { %1580 = vmatpush3.bf16.msra.mxu0 %v1690_v42  ;;  %v1728_v42 = vld [vmem:[#allocation17 + $0x30] sm:$0xff]  }
 0x20a   :  { %v351_v20 = vpop.f32.mrb[0].mxu0 }
 0x20b   :  { %v352_v21 = vadd.f32 %v1361_v19, %v351_v20  ;;  %v1543_v22 = vpop.f32.mrb[1].mxu0 }
 0x20c   :  { %v354_v23 = vpop.f32.mrb[2].mxu0 }
 0x20d   :  { %v357_v24 = vmin.f32 %v352_v21, 20.0  ;;  %v1544_v25 = vpop.f32.mrb[3].mxu0 }
 0x20f   :  { %v358_v26 = vmul.f32 1.442695, %v357_v24 }
 0x211   :  { %1755 = vpow2.f32 %v358_v26 }
 0x21b   :  { %v1756_v27 = vpop.eup %1755 }
 0x21c   :  { %v360_v28 = vadd.f32 2.0, %v1756_v27 }
 0x21e   :  { %v361_v29 = vmul.f32 %v1756_v27, %v360_v28 }
 0x220   :  { %v363_v30 = vadd.f32 2.0, %v361_v29  ;;  %v362_v31 = vmul.f32 %v361_v29, %v352_v21  ;;  %v1715_v29 = vld [vmem:[#allocation17 + $0x40] sm:$0xff]  }
 0x221   :  { %1476 = vmatprep.subr.bf16.mxu0 %v1715_v29 }
 0x222   :  { %1757 = vrcp.f32 %v363_v30  ;;  %v1716_v30 = vld [vmem:[#allocation17] sm:$0xff]  }
 0x22c   :  { %v1758_v32 = vpop.eup %1757 }
 0x22d   :  { %v365_v33 = vmul.f32 %v1758_v32, %v362_v31  ;;  %v1717_v31 = vld [vmem:[#allocation17 + $0x48] sm:$0xff]  }
 0x22e   :  { %v1718_v32 = vld [vmem:[#allocation17 + $0x8] sm:$0xff]  }
 0x22f   :  { %v383_v34 = vpack.c.bf16 %v365_v33, %v365_v33  ;;  %v1719_v33 = vld [vmem:[#allocation17 + $0x50] sm:$0xff]  }
 0x231   :  { %1562 = vmatmul.mubr.bf16.vlgmr.msra.gmra.mrb[0].mxu1 %v383_v34  ;;  %v1720_v34 = vld [vmem:[#allocation17 + $0x10] sm:$0xff]  }
 0x232   :  { %718 = vmatpush1.bf16.msra.mxu1 %v1691_v60  ;;  %749 = vmatprep.mubr.bf16.mxu1 %v2155_v12 }
 0x233   :  { %719 = vmatprep.subr.bf16.mxu1 %v1696_v61 }
 0x236   :  { %720 = vmatpush1.bf16.msra.mxu1 %v1694_v62 }
 0x237   :  { %721 = vmatprep.subr.bf16.mxu1 %v1699_v63 }
 0x23a   :  { %722 = vmatpush1.bf16.msra.mxu1 %v1697_v1 }
 0x23b   :  { %723 = vmatprep.subr.bf16.mxu1 %v1702_v2 }
 0x23e   :  { %724 = vmatpush1.bf16.msra.mxu1 %v1700_v3 }
 0x23f   :  { %725 = vmatprep.subr.bf16.mxu1 %v1705_v4 }
 0x242   :  { %726 = vmatpush1.bf16.msra.mxu1 %v1703_v5 }
 0x243   :  { %727 = vmatprep.subr.bf16.mxu1 %v1708_v6 }
 0x246   :  { %728 = vmatpush1.bf16.msra.mxu1 %v1706_v7 }
 0x247   :  { %729 = vmatprep.subr.bf16.mxu1 %v1711_v8 }
 0x24a   :  { %730 = vmatpush1.bf16.msra.mxu1 %v1709_v9 }
 0x24b   :  { %731 = vmatprep.subr.bf16.mxu1 %v1714_v10 }
 0x24e   :  { %732 = vmatpush1.bf16.msra.mxu1 %v1712_v11 }
 0x24f   :  { %1585 = vmatprep.subr.bf16.mxu1 %v2153_v0 }
 0x304   :  { %v472_v44 = vpop.f32.mrb[0].mxu1 }
 0x305   :  { %v473_v45 = vadd.f32 %v1370_v43, %v472_v44  ;;  %v1563_v46 = vpop.f32.mrb[1].mxu1  ;;  %v1729_v43 = vld [vmem:[#allocation17 + $0x78] sm:$0xff]  }
 0x306   :  { %v475_v47 = vpop.f32.mrb[2].mxu1  ;;  %v1730_v44 = vld [vmem:[#allocation17 + $0x38] sm:$0xff]  }
 0x307   :  { %v478_v48 = vmin.f32 %v473_v45, 20.0  ;;  %v1564_v49 = vpop.f32.mrb[3].mxu1 }
 0x309   :  { %v479_v50 = vmul.f32 1.442695, %v478_v48  ;;  %v624_v48 = vld [vmem:[%s2586_s11] sm:$0x3] }
 0x30b   :  { %1759 = vpow2.f32 %v479_v50 }
 0x315   :  { %v1760_v51 = vpop.eup %1759 }
 0x316   :  { %v481_v52 = vadd.f32 2.0, %v1760_v51 }
 0x318   :  { %v482_v53 = vmul.f32 %v1760_v51, %v481_v52 }
 0x31a   :  { %v484_v54 = vadd.f32 2.0, %v482_v53  ;;  %v483_v55 = vmul.f32 %v482_v53, %v473_v45  ;;  %v627_v45 = vlaneseq }
 0x31c   :  { %1761 = vrcp.f32 %v484_v54  ;;  %v628_v46 = vshrl.u32 %v627_v45, 7 }
 0x31e   :  { %v629_v47 = vsub.s32 0, %v628_v46  ;;  %v633_v49 = vsub.s32 1, %v628_v46  ;;  %v1744_v46 = vld [vmem:[#allocation23 + $0x28] sm:$0xff]  }
 0x320   :  { %v630_v50 = vrot.slane %v624_v48, %v629_v47  ;;  %v634_v51 = vrot.slane %v624_v48, %v633_v49  ;;  %v1745_v47 = vld [vmem:[#allocation23 + $0x30] sm:$0xff]   ;;  %v1746_v48 = vld [vmem:[#allocation23 + $0x38] sm:$0xff]  }
 0x321   :  { %v1421_v49 = vld [vmem:[#allocation21] ss:$0 sm:$0xff] }
 0x326   :  { %v1762_v56 = vpop.eup %1761 }
 0x327   :  { %v486_v57 = vmul.f32 %v1762_v56, %v483_v55 }
 0x329   :  { %v504_v58 = vpack.c.bf16 %v486_v57, %v486_v57 }
 0x32b   :  { %1582 = vmatmul.mubr.bf16.vlgmr.msra.gmra.mrb[4].mxu0 %v504_v58 }
 0x32c   :  { %1477 = vmatpush3.bf16.msra.mxu0 %v1716_v30 }
 0x32d   :  { %1478 = vmatprep.subr.bf16.mxu0 %v1717_v31 }
 0x330   :  { %1479 = vmatpush3.bf16.msra.mxu0 %v1718_v32 }
 0x331   :  { %1480 = vmatprep.subr.bf16.mxu0 %v1719_v33 }
 0x334   :  { %1481 = vmatpush3.bf16.msra.mxu0 %v1720_v34 }
 0x335   :  { %1482 = vmatprep.subr.bf16.mxu0 %v1721_v35 }
 0x338   :  { %1483 = vmatpush3.bf16.msra.mxu0 %v1722_v36 }
 0x339   :  { %1484 = vmatprep.subr.bf16.mxu0 %v1723_v37 }
 0x33c   :  { %1485 = vmatpush3.bf16.msra.mxu0 %v1724_v38 }
 0x33d   :  { %1486 = vmatprep.subr.bf16.mxu0 %v1725_v39 }
 0x340   :  { %1487 = vmatpush3.bf16.msra.mxu0 %v1726_v40  ;;  %v1739_v40 = vld [vmem:[#allocation23] sm:$0xff]  }
 0x341   :  { %1488 = vmatprep.subr.bf16.mxu0 %v1727_v41  ;;  %v1740_v41 = vld [vmem:[#allocation23 + $0x8] sm:$0xff]  }
 0x344   :  { %1489 = vmatpush3.bf16.msra.mxu0 %v1728_v42  ;;  %v1741_v42 = vld [vmem:[#allocation23 + $0x10] sm:$0xff]  }
 0x345   :  { %1490 = vmatprep.subr.bf16.mxu0 %v1729_v43  ;;  %v1742_v43 = vld [vmem:[#allocation23 + $0x18] sm:$0xff]  }
 0x348   :  { %1491 = vmatpush3.bf16.msra.mxu0 %v1730_v44  ;;  %v1743_v44 = vld [vmem:[#allocation23 + $0x20] sm:$0xff]  }
 0x349   :  { %1605 = vmatprep.subr.bf16.mxu0 %v2153_v0 }
 0x3fe   :  { %v593_v14 = vpop.f32.mrb[4].mxu0 }
 0x3ff   :  { %v594_v15 = vadd.f32 %v1379_v13, %v593_v14  ;;  %v1583_v16 = vpop.f32.mrb[5].mxu0 }
 0x400   :  { %v596_v17 = vpop.f32.mrb[6].mxu0  ;;  %v1732_v16 = vld [vmem:[#allocation20 + $0x8] sm:$0xff]  }
 0x401   :  { %v599_v18 = vmin.f32 %v594_v15, 20.0  ;;  %v1584_v19 = vpop.f32.mrb[7].mxu0  ;;  %v1733_v17 = vld [vmem:[#allocation20 + $0x10] sm:$0xff]  }
 0x402   :  { %v1735_v19 = vld [vmem:[#allocation20 + $0x20] sm:$0xff]  }
 0x403   :  { %v600_v20 = vmul.f32 1.442695, %v599_v18  ;;  %v1734_v18 = vld [vmem:[#allocation20 + $0x18] sm:$0xff]  }
 0x405   :  { %1763 = vpow2.f32 %v600_v20  ;;  %v1736_v20 = vld [vmem:[#allocation20 + $0x28] sm:$0xff]  }
 0x40f   :  { %v1764_v21 = vpop.eup %1763 }
 0x410   :  { %v602_v22 = vadd.f32 2.0, %v1764_v21 }
 0x412   :  { %v603_v23 = vmul.f32 %v1764_v21, %v602_v22  ;;  %v1737_v21 = vld [vmem:[#allocation20 + $0x30] sm:$0xff]   ;;  %v1738_v22 = vld [vmem:[#allocation20 + $0x38] sm:$0xff]  }
 0x414   :  { %v605_v24 = vadd.f32 2.0, %v603_v23  ;;  %v604_v25 = vmul.f32 %v603_v23, %v594_v15  ;;  %v1731_v15 = vld [vmem:[#allocation20] sm:$0xff]  }
 0x416   :  { %1765 = vrcp.f32 %v605_v24  ;;  %v1404_v24 = vld [vmem:[#allocation18] ss:$0 sm:$0xff] }
 0x420   :  { %v1766_v26 = vpop.eup %1765 }
 0x421   :  { %v607_v27 = vmul.f32 %v1766_v26, %v604_v25 }
 0x423   :  { %v625_v28 = vpack.c.bf16 %v607_v27, %v607_v27 }
 0x425   :  { %750 = vmatmul.mubr.bf16.vlgmr.msra.gmra.mrb[4].mxu1 %v625_v28 }
 0x426   :  { %1601 = vmatprep.mubr.msk.bf16.mxu1 %vm2154_vm0, %v2153_v0  ;;  %1586 = vmatpush3.bf16.msra.mxu1 %v1731_v15 }
 0x427   :  { %1587 = vmatprep.subr.bf16.mxu1 %v2153_v0 }
 0x42a   :  { %1588 = vmatpush3.bf16.msra.mxu1 %v1732_v16 }
 0x42b   :  { %1589 = vmatprep.subr.bf16.mxu1 %v2153_v0 }
 0x42e   :  { %1590 = vmatpush3.bf16.msra.mxu1 %v1733_v17 }
 0x42f   :  { %1591 = vmatprep.subr.bf16.mxu1 %v2153_v0 }
 0x432   :  { %1592 = vmatpush3.bf16.msra.mxu1 %v1734_v18 }
 0x433   :  { %1593 = vmatprep.subr.bf16.mxu1 %v2153_v0 }
 0x436   :  { %1594 = vmatpush3.bf16.msra.mxu1 %v1735_v19 }
 0x437   :  { %1595 = vmatprep.subr.bf16.mxu1 %v2153_v0 }
 0x43a   :  { %1596 = vmatpush3.bf16.msra.mxu1 %v1736_v20 }
 0x43b   :  { %1597 = vmatprep.subr.bf16.mxu1 %v2153_v0 }
 0x43e   :  { %1598 = vmatpush3.bf16.msra.mxu1 %v1737_v21 }
 0x43f   :  { %1599 = vmatprep.subr.bf16.mxu1 %v2153_v0 }
 0x442   :  { %1600 = vmatpush3.bf16.msra.mxu1 %v1738_v22 }
 0x443   :  { %1625 = vmatprep.subr.bf16.mxu1 %v2153_v0 }
 0x4f8   :  { %v751_v52 = vpop.f32.mrb[4].mxu1 }
 0x4f9   :  { %v752_v53 = vadd.f32 %v751_v52, %v630_v50  ;;  %v753_v54 = vpop.f32.mrb[5].mxu1 }
 0x4fa   :  { %v754_v55 = vadd.f32 %v753_v54, %v634_v51  ;;  %v755_v56 = vpop.f32.mrb[6].mxu1 }
 0x4fb   :  { %v758_v57 = vmin.f32 %v752_v53, 20.0  ;;  %v756_v58 = vpop.f32.mrb[7].mxu1 }
 0x4fc   :  { %v759_v59 = vmin.f32 %v754_v55, 20.0 }
 0x4fd   :  { %v760_v60 = vmul.f32 1.442695, %v758_v57 }
 0x4fe   :  { %v762_v61 = vmul.f32 1.442695, %v759_v59 }
 0x4ff   :  { %1767 = vpow2.f32 %v760_v60 }
 0x500   :  { %1769 = vpow2.f32 %v762_v61 }
 0x509   :  { %v1768_v62 = vpop.eup %1767 }
 0x50a   :  { %v1770_v63 = vpop.eup %1769  ;;  %v764_v1 = vadd.f32 2.0, %v1768_v62 }
 0x50b   :  { %v765_v2 = vadd.f32 2.0, %v1770_v63 }
 0x50c   :  { %v766_v3 = vmul.f32 %v1768_v62, %v764_v1 }
 0x50d   :  { %v767_v4 = vmul.f32 %v1770_v63, %v765_v2  ;;  %v1747_v2 = vld [vmem:[%s2593_s18] sm:$0xff]  }
 0x50e   :  { %v770_v5 = vadd.f32 2.0, %v766_v3  ;;  %v768_v7 = vmul.f32 %v766_v3, %v752_v53  ;;  %v1748_v3 = vld [vmem:[%s2593_s18 + $0x8] sm:$0xff]  }
 0x50f   :  { %v771_v6 = vadd.f32 2.0, %v767_v4  ;;  %v769_v9 = vmul.f32 %v767_v4, %v754_v55  ;;  %v1749_v4 = vld [vmem:[%s2593_s18 + $0x10] sm:$0xff]  }
 0x510   :  { %1771 = vrcp.f32 %v770_v5  ;;  %v1750_v5 = vld [vmem:[%s2593_s18 + $0x18] sm:$0xff]  }
 0x511   :  { %1773 = vrcp.f32 %v771_v6  ;;  %v1751_v6 = vld [vmem:[%s2593_s18 + $0x20] sm:$0xff]  }
 0x51a   :  { %v1772_v8 = vpop.eup %1771 }
 0x51b   :  { %v1774_v10 = vpop.eup %1773  ;;  %v774_v11 = vmul.f32 %v1772_v8, %v768_v7  ;;  %v1752_v7 = vld [vmem:[%s2593_s18 + $0x28] sm:$0xff]   ;;  %v1753_v8 = vld [vmem:[%s2593_s18 + $0x30] sm:$0xff]  }
 0x51c   :  { %v775_v12 = vmul.f32 %v1774_v10, %v769_v9  ;;  %v1754_v9 = vld [vmem:[%s2593_s18 + $0x38] sm:$0xff]   ;;  %v1316_v10 = vld [vmem:[#allocation6] sm:$0xff] }
 0x51d   :  { %v809_v14 = vpack.c.bf16 %v774_v11, %v774_v11  ;;  %v1326_v11 = vmul.f32 %v1316_v10, %v1316_v10 }
 0x51e   :  { %v810_v13 = vpack.c.bf16 %v775_v12, %v775_v12  ;;  %v1430_v12 = vld [vmem:[#allocation24] ss:$0 sm:$0xff] }
 0x51f   :  { %1327 = vadd.xlane.f32.xlu0 %v1326_v11 }
 0x520   :  { %945 = vmatprep.mubr.bf16.mxu0 %v810_v13 }
 0x521   :  { %946 = vmatmul.mubr.bf16.vlgmr.msra.gmra.mrb[8].mxu0 %v809_v14 }
 0x522   :  { %1621 = vmatprep.mubr.msk.bf16.mxu0 %vm2154_vm0, %v2153_v0  ;;  %1606 = vmatpush3.bf16.msra.mxu0 %v1739_v40 }
 0x523   :  { %1607 = vmatprep.subr.bf16.mxu0 %v2153_v0 }
 0x526   :  { %1608 = vmatpush3.bf16.msra.mxu0 %v1740_v41 }
 0x527   :  { %1609 = vmatprep.subr.bf16.mxu0 %v2153_v0 }
 0x52a   :  { %1610 = vmatpush3.bf16.msra.mxu0 %v1741_v42 }
 0x52b   :  { %1611 = vmatprep.subr.bf16.mxu0 %v2153_v0 }
 0x52e   :  { %1612 = vmatpush3.bf16.msra.mxu0 %v1742_v43 }
 0x52f   :  { %1613 = vmatprep.subr.bf16.mxu0 %v2153_v0 }
 0x532   :  { %1614 = vmatpush3.bf16.msra.mxu0 %v1743_v44 }
 0x533   :  { %1615 = vmatprep.subr.bf16.mxu0 %v2153_v0 }
 0x536   :  { %1616 = vmatpush3.bf16.msra.mxu0 %v1744_v46 }
 0x537   :  { %1617 = vmatprep.subr.bf16.mxu0 %v2153_v0 }
 0x53a   :  { %1618 = vmatpush3.bf16.msra.mxu0 %v1745_v47 }
 0x53b   :  { %1619 = vmatprep.subr.bf16.mxu0 %v2153_v0 }
 0x53e   :  { %1620 = vmatpush3.bf16.msra.mxu0 %v1746_v48 }
 0x5f4   :  { %v1492_v23 = vpop.f32.mrb[8].mxu0 }
 0x5f5   :  { %v1493_v25 = vpop.f32.mrb[9].mxu0 }
 0x5f6   :  { %v1494_v26 = vadd.f32 %v1493_v25, %v1492_v23  ;;  %v1495_v27 = vpop.f32.mrb[10].mxu0 }
 0x5f7   :  { %v1496_v28 = vpop.f32.mrb[11].mxu0  ;;  %v1328_v27 = vpop.xlane.xlu0 %1327 }
 0x5f8   :  { %v948_v29 = vadd.f32 %v1494_v26, %v1404_v24  ;;  %v1329_v28 = vmul.f32 -0.5, %v1328_v27 }
 0x5fa   :  { %v953_v30 = vmin.f32 %v948_v29, 20.0 }
 0x5fc   :  { %v954_v31 = vmul.f32 1.442695, %v953_v30  ;;  %v1331_v30 = vstv %s2611_s27 }
 0x5fe   :  { %1775 = vpow2.f32 %v954_v31  ;;  %v1334_v31 = vand.u32 127, %v627_v45 }
 0x600   :  { %vm1335_vm1 = vcmp.eq.s32.totalorder %v1334_v31, 8 }
 0x608   :  { %v1776_v32 = vpop.eup %1775 }
 0x609   :  { %v956_v33 = vadd.f32 2.0, %v1776_v32 }
 0x60b   :  { %v957_v34 = vmul.f32 %v1776_v32, %v956_v33  ;;  %v1439_v32 = vld [vmem:[%s2594_s19] ss:$0 sm:$0xff] }
 0x60d   :  { %v959_v35 = vadd.f32 2.0, %v957_v34  ;;  %v958_v36 = vmul.f32 %v957_v34, %v948_v29  ;;  %v1448_v29 = vld [vmem:[%s2610_s22] ss:$0 sm:$0xff]  ;;  %v1332_v34 = vsub.f32 %v1329_v28, %v1331_v30 }
 0x60e   :  { %v1324_v33 = vmul.f32 %v1448_v29, %v1316_v10 }
 0x60f   :  { %1777 = vrcp.f32 %v959_v35 }
 0x619   :  { %v1778_v37 = vpop.eup %1777 }
 0x61a   :  { %v961_v38 = vmul.f32 %v1778_v37, %v958_v36 }
 0x61c   :  { %v979_v39 = vpack.c.bf16 %v961_v38, %v961_v38 }
 0x61e   :  { %1602 = vmatmul.mubr.bf16.vlgmr.msra.gmra.mrb[8].mxu1 %v979_v39 }
 0x61f   :  { %1641 = vmatprep.mubr.msk.bf16.mxu1 %vm2154_vm0, %v2153_v0  ;;  %1626 = vmatpush3.bf16.msra.mxu1 %v1747_v2 }
 0x620   :  { %1627 = vmatprep.subr.bf16.mxu1 %v2153_v0 }
 0x623   :  { %1628 = vmatpush3.bf16.msra.mxu1 %v1748_v3 }
 0x624   :  { %1629 = vmatprep.subr.bf16.mxu1 %v2153_v0 }
 0x627   :  { %1630 = vmatpush3.bf16.msra.mxu1 %v1749_v4 }
 0x628   :  { %1631 = vmatprep.subr.bf16.mxu1 %v2153_v0 }
 0x62b   :  { %1632 = vmatpush3.bf16.msra.mxu1 %v1750_v5 }
 0x62c   :  { %1633 = vmatprep.subr.bf16.mxu1 %v2153_v0 }
 0x62f   :  { %1634 = vmatpush3.bf16.msra.mxu1 %v1751_v6 }
 0x630   :  { %1635 = vmatprep.subr.bf16.mxu1 %v2153_v0 }
 0x633   :  { %1636 = vmatpush3.bf16.msra.mxu1 %v1752_v7 }
 0x634   :  { %1637 = vmatprep.subr.bf16.mxu1 %v2153_v0 }
 0x637   :  { %1638 = vmatpush3.bf16.msra.mxu1 %v1753_v8 }
 0x638   :  { %1639 = vmatprep.subr.bf16.mxu1 %v2153_v0 }
 0x63b   :  { %1640 = vmatpush3.bf16.msra.mxu1 %v1754_v9 }
 0x6f1   :  { %v1068_v50 = vpop.f32.mrb[8].mxu1 }
 0x6f2   :  { %v1069_v51 = vadd.f32 %v1421_v49, %v1068_v50  ;;  %v1603_v52 = vpop.f32.mrb[9].mxu1 }
 0x6f3   :  { %v1071_v53 = vpop.f32.mrb[10].mxu1 }
 0x6f4   :  { %v1074_v54 = vmin.f32 %v1069_v51, 20.0  ;;  %v1604_v55 = vpop.f32.mrb[11].mxu1 }
 0x6f6   :  { %v1075_v56 = vmul.f32 1.442695, %v1074_v54 }
 0x6f8   :  { %1779 = vpow2.f32 %v1075_v56 }
 0x702   :  { %v1780_v57 = vpop.eup %1779 }
 0x703   :  { %v1077_v58 = vadd.f32 2.0, %v1780_v57 }
 0x705   :  { %v1078_v59 = vmul.f32 %v1780_v57, %v1077_v58 }
 0x707   :  { %v1080_v60 = vadd.f32 2.0, %v1078_v59  ;;  %v1079_v61 = vmul.f32 %v1078_v59, %v1069_v51 }
 0x709   :  { %1781 = vrcp.f32 %v1080_v60 }
 0x713   :  { %v1782_v62 = vpop.eup %1781 }
 0x714   :  { %v1082_v63 = vmul.f32 %v1782_v62, %v1079_v61 }
 0x716   :  { %v1100_v1 = vpack.c.bf16 %v1082_v63, %v1082_v63 }
 0x718   :  { %1622 = vmatmul.mubr.bf16.vlgmr.msra.gmra.mrb[12].mxu0 %v1100_v1 }
 0x7eb   :  { %v1189_v13 = vpop.f32.mrb[12].mxu0 }
 0x7ec   :  { %v1190_v14 = vadd.f32 %v1430_v12, %v1189_v13  ;;  %v1623_v15 = vpop.f32.mrb[13].mxu0 }
 0x7ed   :  { %v1192_v16 = vpop.f32.mrb[14].mxu0 }
 0x7ee   :  { %v1195_v17 = vmin.f32 %v1190_v14, 20.0  ;;  %v1624_v18 = vpop.f32.mrb[15].mxu0 }
 0x7f0   :  { %v1196_v19 = vmul.f32 1.442695, %v1195_v17 }
 0x7f2   :  { %1783 = vpow2.f32 %v1196_v19 }
 0x7fc   :  { %v1784_v20 = vpop.eup %1783 }
 0x7fd   :  { %v1198_v21 = vadd.f32 2.0, %v1784_v20 }
 0x7ff   :  { %v1199_v0 = vmul.f32 %v1784_v20, %v1198_v21 }
 0x801   :  { %v1201_v22 = vadd.f32 2.0, %v1199_v0  ;;  %v1200_v23 = vmul.f32 %v1199_v0, %v1190_v14 }
 0x803   :  { %1785 = vrcp.f32 %v1201_v22 }
 0x80d   :  { %v1786_v24 = vpop.eup %1785 }
 0x80e   :  { %v1203_v25 = vmul.f32 %v1786_v24, %v1200_v23 }
 0x810   :  { %v1221_v26 = vpack.c.bf16 %v1203_v25, %v1203_v25 }
 0x812   :  { %1642 = vmatmul.mubr.bf16.vlgmr.msra.gmra.mrb[12].mxu1 %v1221_v26 }
 0x8e5   :  { %v1310_v35 = vpop.f32.mrb[12].mxu1 }
 0x8e6   :  { %v1311_v36 = vadd.f32 %v1439_v32, %v1310_v35  ;;  %v1643_v37 = vpop.f32.mrb[13].mxu1 }
 0x8e7   :  { %v1313_v38 = vpop.f32.mrb[14].mxu1 }
 0x8e8   :  { %v1325_v39 = vadd.f32 %v1324_v33, %v1311_v36  ;;  %v1644_v40 = vpop.f32.mrb[15].mxu1  ;;  %v1336_v41 = vsel %vm1335_vm1, %v1332_v34, %v1311_v36 }
 0x8e9   :  { %1338 = vst [vmem:[#allocation26 + $0x8] sm:$0xff] %v1336_v41 }
 0x8ea   :  { %1337 = vst [vmem:[#allocation26] sm:$0xff] %v1325_v39 }
 0x8eb   :  { %2106 = shalt.err (!%p2103_p4)
}
 0x8ec   :  { %s2107_s8 = scalar_lea.hbm %s2595_s20, 256 }
 0x8ed   :  { %p2108_p5 = scmp.ne.s32.totalorder %s2595_s20, %s2107_s8  ;;  %p2111_p6 = scmp.lt.u32.totalorder %s2107_s8, %s2595_s20 }
 0x8ef   :  { %p2113_p7 = pnand %p2111_p6, %p2108_p5 }
 0x8f1   :  { %2116 = shalt.err (!%p2113_p7)
}
 0x8f2   :  { %1348 = dma.vmem_to_hbm [thread:$0]  %s1346_s17, 256, %s2595_s20, [#allocation5]  }
 0x8f3   :  { %2133 = dma.done.wait [#allocation5], 256  }
 0x8f4   :  { %2134 = vsyncadd [#allocation5], 4294967040 }
 0x8f5   :  { %1352 = vsyncpa [#allocation4], 1 }
 0x8f6   :  { %1353 = vsyncpa [#allocation7], 1 }
 0x8f7   :  { %1354 = vsyncpa [#allocation10], 1 }
 0x8f8   :  { %1355 = vsyncpa [#allocation13], 1 }
 0x8f9   :  { %1356 = vsyncpa [#allocation16], 1 }
 0x8fa   :  { %1357 = vsyncpa [#allocation19], 1 }
 0x8fb   :  { %1358 = vsyncpa [#allocation22], 1 }
 0x8fc   :  { %1359 = vsyncpa [#allocation25], 1 }
 0x8fd   :  { %1360 = vsyncpa [#allocation5], 1 }

</bundles_post_ra>
